<compile_context>
chip_gen: v7x
topology: tpu7x:2x2x1
jax: 0.10.0
libtpu: 0.0.40
codegen_flags: <defaults>
</compile_context>

<pallas_src>
import functools

import jax
import jax.numpy as jnp
from jax.experimental import pallas as pl
from jax.experimental.pallas import tpu as pltpu


def _round_up(x, m):
    return (x + m - 1) // m * m


# --------------------------------------------------------------------------- kernel
def _sep_lowrank_kernel(x_ref, wdw_ref, *rest, kh, kw, stride, dilation,
                        th_out, wo_pad, fused):
    """One (batch, row-tile) grid step of the fused separable low-rank conv.

    x_ref  : (1, Hp, Wp, Cp)            bf16  zero-padded NHWC plane (resident)
    wdw_ref: (kh*kw, Cp)                bf16  depthwise taps, channels on lanes
    rest   : fused   -> (wf_ref (Cp, Coutp), o_ref)
             unfused -> (wr_ref (Cp, Rp), we_ref (Rp, Coutp), o_ref)
    o_ref  : (1, th_out, wo_pad, Coutp) bf16
    """
    if fused:
        wf_ref, o_ref = rest
    else:
        wr_ref, we_ref, o_ref = rest

    cp = x_ref.shape[3]
    coutp = o_ref.shape[3]

    t = pl.program_id(1)
    h0 = pl.multiple_of(t * th_out, th_out)        # first output row of this tile

    # Hoisted tap loads (f32 so the MAC is safe on v5e's f32-only VPU).
    wdw = wdw_ref[...].astype(jnp.float32)         # (kh*kw, Cp)

    # Depthwise MAC over the kh*kw taps (VPU, f32 accumulation, ~16 vregs).
    acc = jnp.zeros((th_out, wo_pad, cp), jnp.float32)
    for ky in range(kh):
        for kx in range(kw):
            r0 = h0 * stride + ky * dilation
            c0 = kx * dilation
            if stride == 1:
                win = x_ref[0, pl.ds(r0, th_out), pl.ds(c0, wo_pad), :]
            else:
                # TODO(synk): de-stride W into a VMEM scratch once per input
                # row; sublane-strided loads are the slow Mosaic path.
                win = x_ref[0, pl.ds(r0, th_out, stride),
                            pl.ds(c0, wo_pad, stride), :]
            tap = wdw[ky * kw + kx].reshape(1, 1, cp)
            acc = acc + win.astype(jnp.float32) * tap

    # Pointwise on the MXU: bf16 operands, f32 accumulation.
    m = acc.reshape(th_out * wo_pad, cp).astype(jnp.bfloat16)
    if fused:
        y = jnp.dot(m, wf_ref[...], preferred_element_type=jnp.float32)
    else:
        y = jnp.dot(m, wr_ref[...], preferred_element_type=jnp.float32)
        y = jnp.dot(y.astype(jnp.bfloat16), we_ref[...],
                    preferred_element_type=jnp.float32)
    o_ref[...] = y.reshape(1, th_out, wo_pad, coutp).astype(o_ref.dtype)


# --------------------------------------------------------------------------- wrapper
def _forward_impl(x_nchw, wdw_p, pw, *, cin, cout, kh, kw, stride, padding,
                  dilation, cp, coutp, fused):
    b, _, h, w = x_nchw.shape
    ho = (h + 2 * padding - dilation * (kh - 1) - 1) // stride + 1
    wo = (w + 2 * padding - dilation * (kw - 1) - 1) // stride + 1

    # Row-tile / lane-padding geometry.
    wo_pad = _round_up(wo, 8)                        # free (rows*wo, Cp) reshape
    th_out = max(1, min(ho, max(1, 128 // wo_pad)))  # acc ~ th_out*wo_pad*Cp f32
    ho_pad = _round_up(ho, th_out)
    n_row_tiles = ho_pad // th_out

    # Padded input extents so every (strided / dilated) tap window is in bounds.
    hp = max(h + 2 * padding, (ho_pad - 1) * stride + dilation * (kh - 1) + 1)
    wp = max(w + 2 * padding, (wo_pad - 1) * stride + dilation * (kw - 1) + 1)

    # NCHW -> NHWC, bf16, one pad op (spatial zeros + channel lanes to Cp).
    # TODO(synk): for tiny Cin, a layout with W on lanes (+ pltpu.roll for kx
    # shifts) would avoid inflating HBM reads / VPU MACs by Cp/Cin.
    x = jnp.transpose(x_nchw, (0, 2, 3, 1)).astype(jnp.bfloat16)
    xpad = jnp.pad(x, ((0, 0),
                       (padding, hp - h - padding),
                       (padding, wp - w - padding),
                       (0, cp - cin)))

    kernel = functools.partial(
        _sep_lowrank_kernel, kh=kh, kw=kw, stride=stride, dilation=dilation,
        th_out=th_out, wo_pad=wo_pad, fused=fused)

    pw_specs = [pl.BlockSpec(wi.shape, lambda i, t: (0, 0)) for wi in pw]

    flops = 2 * b * ho_pad * wo_pad * cp * kh * kw
    if fused:
        flops += 2 * b * ho_pad * wo_pad * cp * coutp
    else:
        rp = pw[0].shape[1]
        flops += 2 * b * ho_pad * wo_pad * (cp * rp + rp * coutp)
    bytes_accessed = (xpad.size + wdw_p.size + sum(wi.size for wi in pw)
                      + b * ho_pad * wo_pad * coutp) * 2      # all bf16

    out = pl.pallas_call(
        kernel,
        out_shape=jax.ShapeDtypeStruct((b, ho_pad, wo_pad, coutp), jnp.bfloat16),
        grid_spec=pltpu.PrefetchScalarGridSpec(
            num_scalar_prefetch=0,
            grid=(b, n_row_tiles),
            in_specs=[
                # Full padded plane stays resident across the row-tile axis
                # (same block index for every t -> no re-DMA).
                pl.BlockSpec((1, hp, wp, cp), lambda i, t: (i, 0, 0, 0)),
                pl.BlockSpec((kh * kw, cp), lambda i, t: (0, 0)),
            ] + pw_specs,
            out_specs=pl.BlockSpec((1, th_out, wo_pad, coutp),
                                   lambda i, t: (i, t, 0, 0)),
        ),
        compiler_params=pltpu.CompilerParams(
            dimension_semantics=("parallel", "arbitrary")),
        cost_estimate=pl.CostEstimate(flops=flops, transcendentals=0,
                                      bytes_accessed=bytes_accessed),
    )(xpad, wdw_p, *pw)

    # Drop row/col/channel padding, back to NCHW f32 (PyTorch semantics).
    return jnp.transpose(out[:, :ho, :wo, :cout].astype(jnp.float32),
                         (0, 3, 1, 2))


# --------------------------------------------------------------------------- module
class SeparableLowRankConv2dPallas:
    """Pallas TPU port of SeparableLowRankConv2d (no-bias depthwise + low-rank 1x1s)."""

    def __init__(self, in_channels, out_channels, kernel_size, stride, padding,
                 dilation=1, rank=1, key=None):
        key = jax.random.PRNGKey(42) if key is None else key
        k1, k2, k3 = jax.random.split(key, 3)
        kh = kw = int(kernel_size)
        cin, cout, rank = int(in_channels), int(out_channels), int(rank)
        self.cfg = dict(cin=cin, cout=cout, kh=kh, kw=kw, stride=int(stride),
                        padding=int(padding), dilation=int(dilation))

        # f32 master weights (also used by the reference check in __main__).
        self.w_dw = jax.random.normal(
            k1, (kh, kw, cin), jnp.float32) / (kh * kw) ** 0.5
        self.w_reduce = jax.random.normal(
            k2, (cin, rank), jnp.float32) / cin ** 0.5
        self.w_expand = jax.random.normal(
            k3, (rank, cout), jnp.float32) / max(rank, 1) ** 0.5

        cp = _round_up(cin, 128)
        rp = _round_up(rank, 128)
        coutp = _round_up(cout, 128)
        # Fold the low-rank pair at init when the padded-rank pair would cost
        # more MXU MACs than a single fused (Cp, Coutp) matmul.
        fused = cp * coutp <= rp * (cp + coutp)

        self.wdw_p = jnp.zeros((kh * kw, cp), jnp.bfloat16).at[:, :cin].set(
            self.w_dw.reshape(kh * kw, cin).astype(jnp.bfloat16))
        if fused:
            wf = (self.w_reduce @ self.w_expand).astype(jnp.bfloat16)
            self.pw = (jnp.zeros((cp, coutp), jnp.bfloat16)
                       .at[:cin, :cout].set(wf),)
        else:
            wr = jnp.zeros((cp, rp), jnp.bfloat16).at[:cin, :rank].set(
                self.w_reduce.astype(jnp.bfloat16))
            we = jnp.zeros((rp, coutp), jnp.bfloat16).at[:rank, :cout].set(
                self.w_expand.astype(jnp.bfloat16))
            self.pw = (wr, we)

        self._forward = jax.jit(functools.partial(
            _forward_impl, cp=cp, coutp=coutp, fused=fused, **self.cfg))

    def __call__(self, x_nchw):
        assert x_nchw.shape[1] == self.cfg["cin"]
        return self._forward(x_nchw, self.wdw_p, self.pw)


# --------------------------------------------------------------------------- reference (pure JAX, f32)
def _reference_forward(x_nchw, w_dw_kkc, w_reduce, w_expand, stride, padding, dilation):
    cin = w_dw_kkc.shape[2]
    dn = ("NCHW", "OIHW", "NCHW")
    w_dw = jnp.transpose(w_dw_kkc, (2, 0, 1))[:, None, :, :]       # (Cin, 1, kh, kw)
    y = jax.lax.conv_general_dilated(
        x_nchw, w_dw, window_strides=(stride, stride),
        padding=[(padding, padding), (padding, padding)],
        rhs_dilation=(dilation, dilation), dimension_numbers=dn,
        feature_group_count=cin)
    w_r = jnp.transpose(w_reduce, (1, 0))[:, :, None, None]        # (rank, Cin, 1, 1)
    y = jax.lax.conv_general_dilated(y, w_r, (1, 1), [(0, 0), (0, 0)],
                                     dimension_numbers=dn)
    w_e = jnp.transpose(w_expand, (1, 0))[:, :, None, None]        # (Cout, rank, 1, 1)
    y = jax.lax.conv_general_dilated(y, w_e, (1, 1), [(0, 0), (0, 0)],
                                     dimension_numbers=dn)
    return y


# --------------------------------------------------------------------------- main
if __name__ == "__main__":
    key = jax.random.PRNGKey(0)
    kx, kp = jax.random.split(key)

    B, Cin, H, W = 2, 4, 16, 16
    Cout, K, S, P, D, R = 32, 3, 1, 1, 1, 4

    x = jax.random.normal(kx, (B, Cin, H, W), jnp.float32)
    mod = SeparableLowRankConv2dPallas(Cin, Cout, K, S, P, dilation=D, rank=R, key=kp)

    out = mod(x)
    out = jax.block_until_ready(out)

    ref = _reference_forward(x, mod.w_dw, mod.w_reduce, mod.w_expand, S, P, D)
    assert out.shape == ref.shape == (B, Cout, H, W), (out.shape, ref.shape)
    assert bool(jnp.isfinite(out).all())
    max_err = float(jnp.max(jnp.abs(out - ref)))
    assert max_err < 1e-1, max_err
    print("KERNEL_OK")
</pallas_src>

<mosaic_0001>
module attributes {stable_mosaic.version = 11 : i64} {
  func.func @_sep_lowrank_kernel(%arg0: i32, %arg1: i32, %arg2: memref<1x18x18x128xbf16, #tpu.memory_space<vmem>>, %arg3: memref<9x128xbf16, #tpu.memory_space<vmem>>, %arg4: memref<128x128xbf16, #tpu.memory_space<vmem>>, %arg5: memref<1x8x16x128xbf16, #tpu.memory_space<vmem>>) attributes {dimension_semantics = [#tpu.dimension_semantics<parallel>, #tpu.dimension_semantics<arbitrary>], iteration_bounds = array<i64: 2, 2>, scalar_prefetch = 0 : i64, scratch_operands = 0 : i64, tpu.core_type = #tpu.core_type<tc>, window_params = [{transform_indices = @transform_0, window_bounds = array<i64: 1, 18, 18, 128>}, {pipeline_mode = #tpu.pipeline_mode<synchronous>, transform_indices = @transform_1, window_bounds = array<i64: 9, 128>}, {pipeline_mode = #tpu.pipeline_mode<synchronous>, transform_indices = @transform_2, window_bounds = array<i64: 128, 128>}, {transform_indices = @transform_3, window_bounds = array<i64: 1, 8, 16, 128>}]} {
    %c8_i32 = arith.constant 8 : i32
    %0 = arith.muli %arg1, %c8_i32 : i32
    %1 = tpu.assume_multiple %0, 8 : i32
    %c0 = arith.constant 0 : index
    %c0_0 = arith.constant 0 : index
    %2 = vector.load %arg3[%c0, %c0_0] : memref<9x128xbf16, #tpu.memory_space<vmem>>, vector<9x128xbf16>
    %3 = arith.extf %2 : vector<9x128xbf16> to vector<9x128xf32>
    %cst = arith.constant 0.000000e+00 : f32
    %4 = vector.broadcast %cst : f32 to vector<8x16x128xf32>
    %c1_i32 = arith.constant 1 : i32
    %5 = arith.muli %1, %c1_i32 : i32
    %c0_i32 = arith.constant 0 : i32
    %6 = arith.addi %5, %c0_i32 : i32
    %c0_1 = arith.constant 0 : index
    %7 = arith.index_cast %6 : i32 to index
    %c0_2 = arith.constant 0 : index
    %c0_3 = arith.constant 0 : index
    %8 = vector.load %arg2[%c0_1, %7, %c0_2, %c0_3] : memref<1x18x18x128xbf16, #tpu.memory_space<vmem>>, vector<1x8x16x128xbf16>
    %9 = vector.shape_cast %8 : vector<1x8x16x128xbf16> to vector<8x16x128xbf16>
    %10 = vector.extract_strided_slice %3 {offsets = [0, 0], sizes = [1, 128], strides = [1, 1]} : vector<9x128xf32> to vector<1x128xf32>
    %11 = vector.shape_cast %10 : vector<1x128xf32> to vector<128xf32>
    %12 = vector.shape_cast %11 : vector<128xf32> to vector<1x1x128xf32>
    %13 = arith.extf %9 : vector<8x16x128xbf16> to vector<8x16x128xf32>
    %14 = vector.broadcast %12 : vector<1x1x128xf32> to vector<8x16x128xf32>
    %15 = arith.mulf %13, %14 : vector<8x16x128xf32>
    %16 = arith.addf %4, %15 : vector<8x16x128xf32>
    %c1_i32_4 = arith.constant 1 : i32
    %17 = arith.muli %1, %c1_i32_4 : i32
    %c0_i32_5 = arith.constant 0 : i32
    %18 = arith.addi %17, %c0_i32_5 : i32
    %c0_6 = arith.constant 0 : index
    %19 = arith.index_cast %18 : i32 to index
    %c1 = arith.constant 1 : index
    %c0_7 = arith.constant 0 : index
    %20 = vector.load %arg2[%c0_6, %19, %c1, %c0_7] : memref<1x18x18x128xbf16, #tpu.memory_space<vmem>>, vector<1x8x16x128xbf16>
    %21 = vector.shape_cast %20 : vector<1x8x16x128xbf16> to vector<8x16x128xbf16>
    %22 = vector.extract_strided_slice %3 {offsets = [1, 0], sizes = [1, 128], strides = [1, 1]} : vector<9x128xf32> to vector<1x128xf32>
    %23 = vector.shape_cast %22 : vector<1x128xf32> to vector<128xf32>
    %24 = vector.shape_cast %23 : vector<128xf32> to vector<1x1x128xf32>
    %25 = arith.extf %21 : vector<8x16x128xbf16> to vector<8x16x128xf32>
    %26 = vector.broadcast %24 : vector<1x1x128xf32> to vector<8x16x128xf32>
    %27 = arith.mulf %25, %26 : vector<8x16x128xf32>
    %28 = arith.addf %16, %27 : vector<8x16x128xf32>
    %c1_i32_8 = arith.constant 1 : i32
    %29 = arith.muli %1, %c1_i32_8 : i32
    %c0_i32_9 = arith.constant 0 : i32
    %30 = arith.addi %29, %c0_i32_9 : i32
    %c0_10 = arith.constant 0 : index
    %31 = arith.index_cast %30 : i32 to index
    %c2 = arith.constant 2 : index
    %c0_11 = arith.constant 0 : index
    %32 = vector.load %arg2[%c0_10, %31, %c2, %c0_11] : memref<1x18x18x128xbf16, #tpu.memory_space<vmem>>, vector<1x8x16x128xbf16>
    %33 = vector.shape_cast %32 : vector<1x8x16x128xbf16> to vector<8x16x128xbf16>
    %34 = vector.extract_strided_slice %3 {offsets = [2, 0], sizes = [1, 128], strides = [1, 1]} : vector<9x128xf32> to vector<1x128xf32>
    %35 = vector.shape_cast %34 : vector<1x128xf32> to vector<128xf32>
    %36 = vector.shape_cast %35 : vector<128xf32> to vector<1x1x128xf32>
    %37 = arith.extf %33 : vector<8x16x128xbf16> to vector<8x16x128xf32>
    %38 = vector.broadcast %36 : vector<1x1x128xf32> to vector<8x16x128xf32>
    %39 = arith.mulf %37, %38 : vector<8x16x128xf32>
    %40 = arith.addf %28, %39 : vector<8x16x128xf32>
    %c1_i32_12 = arith.constant 1 : i32
    %41 = arith.muli %1, %c1_i32_12 : i32
    %c1_i32_13 = arith.constant 1 : i32
    %42 = arith.addi %41, %c1_i32_13 : i32
    %c0_14 = arith.constant 0 : index
    %43 = arith.index_cast %42 : i32 to index
    %c0_15 = arith.constant 0 : index
    %c0_16 = arith.constant 0 : index
    %44 = vector.load %arg2[%c0_14, %43, %c0_15, %c0_16] : memref<1x18x18x128xbf16, #tpu.memory_space<vmem>>, vector<1x8x16x128xbf16>
    %45 = vector.shape_cast %44 : vector<1x8x16x128xbf16> to vector<8x16x128xbf16>
    %46 = vector.extract_strided_slice %3 {offsets = [3, 0], sizes = [1, 128], strides = [1, 1]} : vector<9x128xf32> to vector<1x128xf32>
    %47 = vector.shape_cast %46 : vector<1x128xf32> to vector<128xf32>
    %48 = vector.shape_cast %47 : vector<128xf32> to vector<1x1x128xf32>
    %49 = arith.extf %45 : vector<8x16x128xbf16> to vector<8x16x128xf32>
    %50 = vector.broadcast %48 : vector<1x1x128xf32> to vector<8x16x128xf32>
    %51 = arith.mulf %49, %50 : vector<8x16x128xf32>
    %52 = arith.addf %40, %51 : vector<8x16x128xf32>
    %c1_i32_17 = arith.constant 1 : i32
    %53 = arith.muli %1, %c1_i32_17 : i32
    %c1_i32_18 = arith.constant 1 : i32
    %54 = arith.addi %53, %c1_i32_18 : i32
    %c0_19 = arith.constant 0 : index
    %55 = arith.index_cast %54 : i32 to index
    %c1_20 = arith.constant 1 : index
    %c0_21 = arith.constant 0 : index
    %56 = vector.load %arg2[%c0_19, %55, %c1_20, %c0_21] : memref<1x18x18x128xbf16, #tpu.memory_space<vmem>>, vector<1x8x16x128xbf16>
    %57 = vector.shape_cast %56 : vector<1x8x16x128xbf16> to vector<8x16x128xbf16>
    %58 = vector.extract_strided_slice %3 {offsets = [4, 0], sizes = [1, 128], strides = [1, 1]} : vector<9x128xf32> to vector<1x128xf32>
    %59 = vector.shape_cast %58 : vector<1x128xf32> to vector<128xf32>
    %60 = vector.shape_cast %59 : vector<128xf32> to vector<1x1x128xf32>
    %61 = arith.extf %57 : vector<8x16x128xbf16> to vector<8x16x128xf32>
    %62 = vector.broadcast %60 : vector<1x1x128xf32> to vector<8x16x128xf32>
    %63 = arith.mulf %61, %62 : vector<8x16x128xf32>
    %64 = arith.addf %52, %63 : vector<8x16x128xf32>
    %c1_i32_22 = arith.constant 1 : i32
    %65 = arith.muli %1, %c1_i32_22 : i32
    %c1_i32_23 = arith.constant 1 : i32
    %66 = arith.addi %65, %c1_i32_23 : i32
    %c0_24 = arith.constant 0 : index
    %67 = arith.index_cast %66 : i32 to index
    %c2_25 = arith.constant 2 : index
    %c0_26 = arith.constant 0 : index
    %68 = vector.load %arg2[%c0_24, %67, %c2_25, %c0_26] : memref<1x18x18x128xbf16, #tpu.memory_space<vmem>>, vector<1x8x16x128xbf16>
    %69 = vector.shape_cast %68 : vector<1x8x16x128xbf16> to vector<8x16x128xbf16>
    %70 = vector.extract_strided_slice %3 {offsets = [5, 0], sizes = [1, 128], strides = [1, 1]} : vector<9x128xf32> to vector<1x128xf32>
    %71 = vector.shape_cast %70 : vector<1x128xf32> to vector<128xf32>
    %72 = vector.shape_cast %71 : vector<128xf32> to vector<1x1x128xf32>
    %73 = arith.extf %69 : vector<8x16x128xbf16> to vector<8x16x128xf32>
    %74 = vector.broadcast %72 : vector<1x1x128xf32> to vector<8x16x128xf32>
    %75 = arith.mulf %73, %74 : vector<8x16x128xf32>
    %76 = arith.addf %64, %75 : vector<8x16x128xf32>
    %c1_i32_27 = arith.constant 1 : i32
    %77 = arith.muli %1, %c1_i32_27 : i32
    %c2_i32 = arith.constant 2 : i32
    %78 = arith.addi %77, %c2_i32 : i32
    %c0_28 = arith.constant 0 : index
    %79 = arith.index_cast %78 : i32 to index
    %c0_29 = arith.constant 0 : index
    %c0_30 = arith.constant 0 : index
    %80 = vector.load %arg2[%c0_28, %79, %c0_29, %c0_30] : memref<1x18x18x128xbf16, #tpu.memory_space<vmem>>, vector<1x8x16x128xbf16>
    %81 = vector.shape_cast %80 : vector<1x8x16x128xbf16> to vector<8x16x128xbf16>
    %82 = vector.extract_strided_slice %3 {offsets = [6, 0], sizes = [1, 128], strides = [1, 1]} : vector<9x128xf32> to vector<1x128xf32>
    %83 = vector.shape_cast %82 : vector<1x128xf32> to vector<128xf32>
    %84 = vector.shape_cast %83 : vector<128xf32> to vector<1x1x128xf32>
    %85 = arith.extf %81 : vector<8x16x128xbf16> to vector<8x16x128xf32>
    %86 = vector.broadcast %84 : vector<1x1x128xf32> to vector<8x16x128xf32>
    %87 = arith.mulf %85, %86 : vector<8x16x128xf32>
    %88 = arith.addf %76, %87 : vector<8x16x128xf32>
    %c1_i32_31 = arith.constant 1 : i32
    %89 = arith.muli %1, %c1_i32_31 : i32
    %c2_i32_32 = arith.constant 2 : i32
    %90 = arith.addi %89, %c2_i32_32 : i32
    %c0_33 = arith.constant 0 : index
    %91 = arith.index_cast %90 : i32 to index
    %c1_34 = arith.constant 1 : index
    %c0_35 = arith.constant 0 : index
    %92 = vector.load %arg2[%c0_33, %91, %c1_34, %c0_35] : memref<1x18x18x128xbf16, #tpu.memory_space<vmem>>, vector<1x8x16x128xbf16>
    %93 = vector.shape_cast %92 : vector<1x8x16x128xbf16> to vector<8x16x128xbf16>
    %94 = vector.extract_strided_slice %3 {offsets = [7, 0], sizes = [1, 128], strides = [1, 1]} : vector<9x128xf32> to vector<1x128xf32>
    %95 = vector.shape_cast %94 : vector<1x128xf32> to vector<128xf32>
    %96 = vector.shape_cast %95 : vector<128xf32> to vector<1x1x128xf32>
    %97 = arith.extf %93 : vector<8x16x128xbf16> to vector<8x16x128xf32>
    %98 = vector.broadcast %96 : vector<1x1x128xf32> to vector<8x16x128xf32>
    %99 = arith.mulf %97, %98 : vector<8x16x128xf32>
    %100 = arith.addf %88, %99 : vector<8x16x128xf32>
    %c1_i32_36 = arith.constant 1 : i32
    %101 = arith.muli %1, %c1_i32_36 : i32
    %c2_i32_37 = arith.constant 2 : i32
    %102 = arith.addi %101, %c2_i32_37 : i32
    %c0_38 = arith.constant 0 : index
    %103 = arith.index_cast %102 : i32 to index
    %c2_39 = arith.constant 2 : index
    %c0_40 = arith.constant 0 : index
    %104 = vector.load %arg2[%c0_38, %103, %c2_39, %c0_40] : memref<1x18x18x128xbf16, #tpu.memory_space<vmem>>, vector<1x8x16x128xbf16>
    %105 = vector.shape_cast %104 : vector<1x8x16x128xbf16> to vector<8x16x128xbf16>
    %106 = vector.extract_strided_slice %3 {offsets = [8, 0], sizes = [1, 128], strides = [1, 1]} : vector<9x128xf32> to vector<1x128xf32>
    %107 = vector.shape_cast %106 : vector<1x128xf32> to vector<128xf32>
    %108 = vector.shape_cast %107 : vector<128xf32> to vector<1x1x128xf32>
    %109 = arith.extf %105 : vector<8x16x128xbf16> to vector<8x16x128xf32>
    %110 = vector.broadcast %108 : vector<1x1x128xf32> to vector<8x16x128xf32>
    %111 = arith.mulf %109, %110 : vector<8x16x128xf32>
    %112 = arith.addf %100, %111 : vector<8x16x128xf32>
    %113 = vector.shape_cast %112 : vector<8x16x128xf32> to vector<128x128xf32>
    %114 = arith.truncf %113 : vector<128x128xf32> to vector<128x128xbf16>
    %c0_41 = arith.constant 0 : index
    %c0_42 = arith.constant 0 : index
    %115 = vector.load %arg4[%c0_41, %c0_42] : memref<128x128xbf16, #tpu.memory_space<vmem>>, vector<128x128xbf16>
    %cst_43 = arith.constant dense<0.000000e+00> : vector<128x128xf32>
    %116 = tpu.matmul %114, %115, %cst_43 {dimension_numbers = #tpu.dot_dimension_numbers<[1], [0], [0], [1], [0, 0, 1, 1], [], []>} : vector<128x128xbf16>, vector<128x128xbf16>, vector<128x128xf32> -> vector<128x128xf32>
    %117 = vector.shape_cast %116 : vector<128x128xf32> to vector<1x8x16x128xf32>
    %118 = arith.truncf %117 : vector<1x8x16x128xf32> to vector<1x8x16x128xbf16>
    %c0_44 = arith.constant 0 : index
    %c0_45 = arith.constant 0 : index
    %c0_46 = arith.constant 0 : index
    %c0_47 = arith.constant 0 : index
    %119 = vector.load %arg5[%c0_44, %c0_45, %c0_46, %c0_47] : memref<1x8x16x128xbf16, #tpu.memory_space<vmem>>, vector<1x8x16x128xbf16>
    tpu.vector_store %arg5[%c0_44, %c0_45, %c0_46, %c0_47], %118 {strides = array<i32>} : memref<1x8x16x128xbf16, #tpu.memory_space<vmem>>, vector<1x8x16x128xbf16>,
    return
  }
  func.func @transform_0(%arg0: i32, %arg1: i32) -> (i32, i32, i32, i32) {
    %c0_i32 = arith.constant 0 : i32
    %c0_i32_0 = arith.constant 0 : i32
    %c0_i32_1 = arith.constant 0 : i32
    %c0_i32_2 = arith.constant 0 : i32
    return %arg0, %c0_i32, %c0_i32_0, %c0_i32_1 : i32, i32, i32, i32
  }
  func.func @transform_1(%arg0: i32, %arg1: i32) -> (i32, i32) {
    %c0_i32 = arith.constant 0 : i32
    %c0_i32_0 = arith.constant 0 : i32
    %c0_i32_1 = arith.constant 0 : i32
    return %c0_i32, %c0_i32_0 : i32, i32
  }
  func.func @transform_2(%arg0: i32, %arg1: i32) -> (i32, i32) {
    %c0_i32 = arith.constant 0 : i32
    %c0_i32_0 = arith.constant 0 : i32
    %c0_i32_1 = arith.constant 0 : i32
    return %c0_i32, %c0_i32_0 : i32, i32
  }
  func.func @transform_3(%arg0: i32, %arg1: i32) -> (i32, i32, i32, i32) {
    %c0_i32 = arith.constant 0 : i32
    %c0_i32_0 = arith.constant 0 : i32
    %c0_i32_1 = arith.constant 0 : i32
    return %arg0, %arg1, %c0_i32, %c0_i32_0 : i32, i32, i32, i32
  }
}

</mosaic_0001>

<bundles_post_ra>
// kernel: _forward_impl.1
= control target key start
LH: loop header
LB: loop body
LE: loop exit
PB: predicated region body
PF: predicated region fallthrough
CT: control target
= control target key end

     0   :  { %s2011_s12 = smov 0   ;;  %s2013_s13 = smov 0   ;;  %s2593_s0 = inlined_call_operand.vmem [shape: bf16[2,18,18,128], index: 0, kind: input, shape index: {}]   ;;  %s2594_s1 = inlined_call_operand.vmem [shape: bf16[9,128], index: 1, kind: input, shape index: {}]   ;;  %s2595_s2 = inlined_call_operand.vmem [shape: bf16[128,128], index: 2, kind: input, shape index: {}]   ;;  %s2596_s3 = inlined_call_operand.vmem [shape: bf16[2,16,16,128], index: 3, kind: output, shape index: {}]  }
   0x1   :  { %s2015_s14 = smov 0   ;;  %s2017_s15 = smov 0  }
   0x2   :  { %s2019_s16 = smov 0  }
   0x3 LB: > { %s22_s17 = sadd.s32 1, %s1981_s14  ;;  %s25_s18 = sadd.s32 1, %s1985_s15  ;;  %s1989_s16 = sphi %s2019_s16, %s13_s16   ;;  %s1985_s15 = sphi %s2017_s15, %s2600_s15   ;;  %s1981_s14 = sphi %s2015_s14, %s2599_s14   ;;  %s1977_s13 = sphi %s2013_s13, %s2598_s13   ;;  %s1973_s12 = sphi %s2011_s12, %s2597_s12  }
   0x4   : > { %p23_p0 = scmp.ge.s32.totalorder %s22_s17, 2  ;;  %p1612_p1 = scmp.ge.s32.totalorder %s1989_s16, 1 }
   0x5   : > { %p151_p2 = scmp.lt.s32.totalorder %s1989_s16, 5 }
   0x6   : > { %s2602_s17 = smov (%p23_p0, %s22_s17), 0  ;;  %s2604_s18 = smov (!%p23_p0, %s25_s18), %s1985_s15 }
   0x7   : > { %p152_p3 = pnand %p1612_p1, %p151_p2  ;;  %p27_p4 = scmp.ge.s32.totalorder %s2604_s18, 2 }
   0x8   : > { %v1943_v0 = vld [vmem:[%s2595_s2] sm:$0xff] (!%p152_p3)   ;;  %p180_p5 = scmp.lt.s32.totalorder (!%p152_p3), %s1977_s13, 1  ;;  %v237_v1 = vlaneseq (!%p152_p3)  ;;  %v1944_v2 = vld [vmem:[%s2595_s2 + $0x8] sm:$0xff] (!%p152_p3)   ;;  %s1715_s23 = smul.u32 (!%p152_p3), 96, %s1973_s12  ;;  %v1945_v4 = vld [vmem:[%s2595_s2 + $0x10] sm:$0xff] (!%p152_p3)   ;;  %vm341_vm0 = vcmask (!%p152_p3), 1046528  }
   0x9   : > { %s2606_s18 = smov (%p27_p4, %s2604_s18), 0  ;;  %155 = sbr.rel (%p152_p3) target bundleno = 409 (0x199), region = 32 }
   0xa   : > { %1854 = vmatprep.subr.bf16.mxu0 (!%p152_p3), %v1943_v0  ;;  %1886 = vmatprep.subr.bf16.mxu1 (!%p152_p3), %v1943_v0  ;;  %v2052_v3 = vshrl.u32 (!%p152_p3), %v237_v1, 7  ;;  %v1946_v5 = vld [vmem:[%s2595_s2 + $0x18] sm:$0xff] (!%p152_p3)   ;;  %v198_v8 = vld [vmem:[%s2594_s1] sm:$0xf] (!%p152_p3)  ;;  %v2074_v9 = vld [vmem:[%s2594_s1 + $0x4] sm:$0x1] (!%p152_p3) }
   0xb   : > { %1855 = vmatpush3.bf16.msra.mxu0 (!%p152_p3), %v1943_v0  ;;  %1894 = vmatpush3.bf16.msra.mxu1 (!%p152_p3), %v1943_v0  ;;  %v2078_v12 = vunpack.c.l.bf16 (!%p152_p3), %v198_v8  ;;  %v201_v13 = vunpack.c.l.bf16 (!%p152_p3), %v2074_v9  ;;  %vm482_vm1 = vcmask (!%p152_p3), 1045504   ;;  %v1947_v28 = vld [vmem:[%s2595_s2 + $0x20] sm:$0xff] (!%p152_p3)   ;;  %v1948_v45 = vld [vmem:[%s2595_s2 + $0x28] sm:$0xff] (!%p152_p3)   ;;  %v1949_v0 = vld [vmem:[%s2595_s2 + $0x30] sm:$0xff] (!%p152_p3)   ;;  %s1614_s25 = sshll.u32 (!%p152_p3), %s1973_s12, 3 }
   0xc   : > { %1856 = vmatprep.subr.bf16.mxu0 (!%p152_p3), %v1944_v2  ;;  %1887 = vmatprep.subr.bf16.mxu1 (!%p152_p3), %v1944_v2  ;;  %v239_v6 = vsub.s32 (!%p152_p3), 0, %v2052_v3  ;;  %v291_v7 = vsub.s32 (!%p152_p3), 1, %v2052_v3  ;;  %v432_v11 = vsub.s32 (!%p152_p3), 2, %v2052_v3  ;;  %v593_v29 = vsub.s32 (!%p152_p3), 3, %v2052_v3  ;;  %p188_p6 = scmp.lt.s32.totalorder (!%p152_p3), %s1614_s25, 15 }
   0xd   : > { %v645_v31 = vsub.s32 (!%p152_p3), 4, %v2052_v3 }
   0xe   : > { %v2093_v24 = vrot.slane (!%p152_p3), %v2078_v12, %v239_v6  ;;  %v2096_v25 = vrot.slane (!%p152_p3), %v2078_v12, %v291_v7  ;;  %v2099_v26 = vrot.slane (!%p152_p3), %v2078_v12, %v432_v11  ;;  %v2119_v43 = vrot.slane (!%p152_p3), %v2078_v12, %v593_v29 }
   0xf   : > { %1857 = vmatpush3.bf16.msra.mxu0 (!%p152_p3), %v1944_v2  ;;  %1895 = vmatpush3.bf16.msra.mxu1 (!%p152_p3), %v1944_v2  ;;  %v2122_v44 = vrot.slane (!%p152_p3), %v2078_v12, %v645_v31  ;;  %v785_v2 = vsub.s32 (!%p152_p3), 5, %v2052_v3  ;;  %v1950_v31 = vld [vmem:[%s2595_s2 + $0x38] sm:$0xff] (!%p152_p3)  }
  0x10   : > { %s2608_s13 = smov (!%p180_p5, %s1977_s13), 1  ;;  %1858 = vmatprep.subr.bf16.mxu0 %v1945_v4  ;;  %1888 = vmatprep.subr.bf16.mxu1 %v1945_v4  ;;  %s2610_s25 = smov (!%p188_p6, %s1614_s25), 15 }
  0x11   : > { %s1902_s26 = smul.u32 216, %s2608_s13  ;;  %s1616_s27 = sshll.u32 %s2608_s13, 5 }
  0x13   : > { %s184_s4 = scalar_lea.vmem %s2593_s0, %s1902_s26  ;;  %1859 = vmatpush3.bf16.msra.mxu0 %v1945_v4  ;;  %1896 = vmatpush3.bf16.msra.mxu1 %v1945_v4  ;;  %s1615_s26 = sshll.u32 %s2610_s25, 1 }
  0x14   : > { %s2065_s5 = scalar_lea.vmem %s184_s4, %s1715_s23  ;;  %1860 = vmatprep.subr.bf16.mxu0 %v1946_v5  ;;  %1889 = vmatprep.subr.bf16.mxu1 %v1946_v5  ;;  %s192_s28 = sadd.s32 %s1616_s27, %s1615_s26 }
  0x15   : > { %v1733_v10 = vld [vmem:[%s2065_s5] sm:$0xff]   ;;  %v273_v16 = vld [vmem:[%s2065_s5 + $0x8] sm:$0x1]  ;;  %v1623_v18 = vld [vmem:[%s2065_s5 + $0xc] sm:$0xff]   ;;  %s1617_s29 = sshll.u32 %s192_s28, 2 }
  0x16   : > { %v1734_v14 = vunpack.c.l.bf16 %v1733_v10  ;;  %v1735_v15 = vunpack.c.h.bf16 %v1733_v10  ;;  %v414_v17 = vld [vmem:[%s2065_s5] sm:$0xe]  ;;  %v281_v19 = vunpack.c.l.bf16 %v273_v16  ;;  %v575_v21 = vunpack.c.l.bf16 %v1623_v18  ;;  %v2085_v22 = vld [vmem:[%s2065_s5 + $0x14] sm:$0x1]  ;;  %v2088_v23 = vld [vmem:[%s2065_s5 + $0xc] sm:$0xe] }
  0x17   : > { %v422_v20 = vunpack.c.l.bf16 %v414_v17  ;;  %v2101_v27 = vunpack.c.h.bf16 %v1623_v18  ;;  %v635_v30 = vunpack.c.l.bf16 %v2085_v22  ;;  %v775_v32 = vunpack.c.l.bf16 %v2088_v23  ;;  %1861 = vmatpush3.bf16.msra.mxu0 %v1946_v5  ;;  %1897 = vmatpush3.bf16.msra.mxu1 %v1946_v5  ;;  %v1827_v54 = vld [vmem:[%s2065_s5 + $0x18] sm:$0xff]   ;;  %v2142_v63 = vld [vmem:[%s2065_s5 + $0x20] sm:$0x1] }
  0x18   : > { %v241_v33 = vmul.f32 %v1734_v14, %v2093_v24  ;;  %v242_v34 = vmul.f32 %v1735_v15, %v2093_v24  ;;  %v293_v35 = vmul.f32 %v1734_v14, %v2096_v25  ;;  %v294_v36 = vmul.f32 %v1735_v15, %v2096_v25  ;;  %1862 = vmatprep.subr.bf16.mxu0 %v1947_v28  ;;  %v1681_v7 = vld [vmem:[%s2065_s5 + $0x18] sm:$0xe] }
  0x19   : > { %v295_v37 = vmul.f32 %v2096_v25, %v281_v19  ;;  %v434_v38 = vmul.f32 %v2099_v26, %v422_v20  ;;  %v435_v39 = vmul.f32 %v1735_v15, %v2099_v26  ;;  %v436_v40 = vmul.f32 %v2099_v26, %v281_v19  ;;  %1890 = vmatprep.subr.bf16.mxu1 %v1947_v28  ;;  %v1821_v15 = vld [vmem:[%s2065_s5 + $0x30] sm:$0xff]  }
  0x1a   : > { %v342_v41 = vrot.slane %v293_v35, 1  ;;  %v343_v42 = vrot.slane %v294_v36, 1  ;;  %v595_v51 = vmul.f32 %v2119_v43, %v575_v21  ;;  %v596_v52 = vmul.f32 %v2119_v43, %v2101_v27 }
  0x1b   : > { %v345_v46 = vrot.slane %v295_v37, 1  ;;  %v483_v47 = vrot.slane %v434_v38, 2  ;;  %v484_v48 = vrot.slane %v435_v39, 2  ;;  %v486_v49 = vrot.slane %v436_v40, 2  ;;  %1863 = vmatpush3.bf16.msra.mxu0 %v1947_v28  ;;  %1898 = vmatpush3.bf16.msra.mxu1 %v1947_v28 }
  0x1c   : > { %v344_v50 = vsel %vm341_vm0, %v342_v41, %v343_v42  ;;  %v647_v53 = vmul.f32 %v2122_v44, %v575_v21  ;;  %v648_v60 = vmul.f32 %v2122_v44, %v2101_v27  ;;  %v649_v61 = vmul.f32 %v2122_v44, %v635_v30  ;;  %1864 = vmatprep.subr.bf16.mxu0 %v1948_v45  ;;  %v277_v41 = vld [vmem:[%s2065_s5 + $0x38] sm:$0x1] }
  0x1d   : > { %v346_v55 = vsel %vm341_vm0, %v343_v42, %v345_v46  ;;  %v398_v56 = vadd.f32 %v344_v50, %v241_v33  ;;  %v485_v57 = vsel %vm482_vm1, %v483_v47, %v484_v48  ;;  %v487_v58 = vsel %vm482_vm1, %v484_v48, %v486_v49  ;;  %1891 = vmatprep.subr.bf16.mxu1 %v1948_v45 }
  0x1e   : > { %v399_v59 = vadd.f32 %v346_v55, %v242_v34  ;;  %v695_v62 = vrot.slane %v647_v53, 1  ;;  %v2148_v4 = vunpack.c.l.bf16 %v1827_v54  ;;  %v2150_v5 = vunpack.c.h.bf16 %v1827_v54 }
  0x1f   : > { %v539_v1 = vadd.f32 %v485_v57, %v398_v56  ;;  %v696_v10 = vrot.slane %v648_v60, 1  ;;  %v698_v11 = vrot.slane %v649_v61, 1  ;;  %v945_v14 = vsub.s32 6, %v2052_v3  ;;  %1865 = vmatpush3.bf16.msra.mxu0 %v1948_v45  ;;  %1899 = vmatpush3.bf16.msra.mxu1 %v1948_v45 }
  0x20   : > { %v540_v8 = vadd.f32 %v487_v58, %v399_v59  ;;  %v2156_v17 = vrot.slane %v2078_v12, %v785_v2  ;;  %v987_v18 = vunpack.c.l.bf16 %v2142_v63  ;;  %v997_v19 = vsub.s32 7, %v2052_v3  ;;  %1866 = vmatprep.subr.bf16.mxu0 %v1949_v0  ;;  %1892 = vmatprep.subr.bf16.mxu1 %v1949_v0 }
  0x21   : > { %v611_v16 = vadd.f32 %v595_v51, %v539_v1  ;;  %v697_v21 = vsel %vm341_vm0, %v695_v62, %v696_v10  ;;  %v699_v28 = vsel %vm341_vm0, %v696_v10, %v698_v11  ;;  %v1127_v29 = vunpack.c.l.bf16 %v1681_v7  ;;  %v418_v62 = vld [vmem:[%s2065_s5 + $0x30] sm:$0xe] }
  0x22   : > { %v612_v20 = vadd.f32 %v596_v52, %v540_v8  ;;  %v787_v34 = vmul.f32 %v2156_v17, %v775_v32  ;;  %v788_v35 = vmul.f32 %v2156_v17, %v2101_v27  ;;  %v2170_v36 = vunpack.c.l.bf16 %v1821_v15 }
  0x23   : > { %v751_v33 = vadd.f32 %v697_v21, %v611_v16  ;;  %v789_v38 = vmul.f32 %v2156_v17, %v635_v30  ;;  %v2176_v39 = vrot.slane %v2078_v12, %v945_v14  ;;  %v2179_v40 = vrot.slane %v2078_v12, %v997_v19  ;;  %1867 = vmatpush3.bf16.msra.mxu0 %v1949_v0  ;;  %v1631_v14 = vld [vmem:[%s2065_s5 + $0x3c] sm:$0xff]  }
  0x24   : > { %v752_v37 = vadd.f32 %v699_v28, %v612_v20  ;;  %v835_v23 = vrot.slane %v787_v34, 2  ;;  %v836_v42 = vrot.slane %v788_v35, 2  ;;  %v2186_v27 = vrot.slane %v201_v13, %v239_v6  ;;  %1900 = vmatpush3.bf16.msra.mxu1 %v1949_v0  ;;  %1868 = vmatprep.subr.bf16.mxu0 %v1950_v31 }
  0x25   : > { %v2188_v32 = vunpack.c.h.bf16 %v1821_v15  ;;  %v838_v22 = vrot.slane %v789_v38, 2  ;;  %v947_v30 = vmul.f32 %v2148_v4, %v2176_v39  ;;  %v948_v12 = vmul.f32 %v2150_v5, %v2176_v39  ;;  %1893 = vmatprep.subr.bf16.mxu1 %v1950_v31 }
  0x26   : > { %v999_v45 = vmul.f32 %v2148_v4, %v2179_v40  ;;  %v837_v3 = vsel %vm482_vm1, %v835_v23, %v836_v42  ;;  %v1000_v6 = vmul.f32 %v2150_v5, %v2179_v40  ;;  %v1001_v9 = vmul.f32 %v2179_v40, %v987_v18 }
  0x27   : > { %v285_v13 = vunpack.c.l.bf16 %v277_v41  ;;  %v839_v46 = vsel %vm482_vm1, %v836_v42, %v838_v22  ;;  %v891_v47 = vadd.f32 %v837_v3, %v751_v33  ;;  %v1139_v49 = vmul.f32 %v2186_v27, %v1127_v29  ;;  %1869 = vmatpush3.bf16.msra.mxu0 %v1950_v31  ;;  %v1651_v22 = vld [vmem:[%s2065_s5 + $0x3c] sm:$0xe] }
  0x28   : > { %v1047_v48 = vrot.slane %v999_v45, 1  ;;  %v892_v50 = vadd.f32 %v839_v46, %v752_v37  ;;  %v1048_v51 = vrot.slane %v1000_v6, 1  ;;  %v1050_v52 = vrot.slane %v1001_v9, 1  ;;  %1901 = vmatpush3.bf16.msra.mxu1 %v1950_v31  ;;  %v1643_v37 = vld [vmem:[%s2065_s5 + $0x44] sm:$0x1] }
  0x29   : > { %v1140_v53 = vmul.f32 %v2150_v5, %v2186_v27  ;;  %v963_v54 = vadd.f32 %v947_v30, %v891_v47  ;;  %v1141_v55 = vmul.f32 %v2186_v27, %v987_v18  ;;  %v1187_v56 = vrot.slane %v1139_v49, 2 }
  0x2a   : > { %v249_v57 = vmul.f32 %v2170_v36, %v2093_v24  ;;  %v964_v58 = vadd.f32 %v948_v12, %v892_v50  ;;  %v1049_v59 = vsel %vm341_vm0, %v1047_v48, %v1048_v51  ;;  %v1051_v60 = vsel %vm341_vm0, %v1048_v51, %v1050_v52  ;;  %v1829_v51 = vld [vmem:[%s2065_s5 + $0x48] sm:$0xff]  }
  0x2b   : > { %v1188_v61 = vrot.slane %v1140_v53, 2  ;;  %v1103_v63 = vadd.f32 %v1049_v59, %v963_v54  ;;  %v1190_v0 = vrot.slane %v1141_v55, 2  ;;  %v250_v1 = vmul.f32 %v2188_v32, %v2093_v24 }
  0x2c   : > { %v305_v2 = vmul.f32 %v2170_v36, %v2096_v25  ;;  %v1104_v7 = vadd.f32 %v1051_v60, %v964_v58  ;;  %v306_v10 = vmul.f32 %v2188_v32, %v2096_v25  ;;  %v307_v11 = vmul.f32 %v2096_v25, %v285_v13 }
  0x2d   : > { %v1189_v8 = vsel %vm482_vm1, %v1187_v56, %v1188_v61  ;;  %v1191_v15 = vsel %vm482_vm1, %v1188_v61, %v1190_v0  ;;  %v426_v19 = vunpack.c.l.bf16 %v418_v62  ;;  %v447_v29 = vmul.f32 %v2188_v32, %v2099_v26  ;;  %v1677_v0 = vld [vmem:[%s2065_s5 + $0x50] sm:$0x1] }
  0x2e   : > { %v1243_v16 = vadd.f32 %v1189_v8, %v1103_v63  ;;  %v362_v18 = vrot.slane %v305_v2, 1  ;;  %v1244_v20 = vadd.f32 %v1191_v15, %v1104_v7  ;;  %v363_v21 = vrot.slane %v306_v10, 1 }
  0x2f   : > { %v365_v28 = vrot.slane %v307_v11, 1  ;;  %v446_v31 = vmul.f32 %v2099_v26, %v426_v19  ;;  %v448_v33 = vmul.f32 %v2099_v26, %v285_v13  ;;  %v583_v34 = vunpack.c.l.bf16 %v1631_v14 }
  0x30   : > { %v584_v35 = vunpack.c.h.bf16 %v1631_v14  ;;  %v1259_v38 = vpack.c.bf16 %v1244_v20, %v1243_v16  ;;  %v364_v41 = vsel %vm341_vm0, %v362_v18, %v363_v21  ;;  %v504_v42 = vrot.slane %v447_v29, 2  ;;  %v1685_v16 = vld [vmem:[%s2065_s5 + $0x48] sm:$0xe] }
  0x31   : > { %v366_v23 = vsel %vm341_vm0, %v363_v21, %v365_v28  ;;  %v406_v30 = vadd.f32 %v364_v41, %v249_v57  ;;  %v503_v45 = vrot.slane %v446_v31, 2  ;;  %v506_v3 = vrot.slane %v448_v33, 2  ;;  %v207_v41 = vld [vmem:[%s2065_s5 + $0xc] sm:$0xff]  }
  0x32   : > { %v407_v12 = vadd.f32 %v366_v23, %v250_v1  ;;  %1870 = vmatprep.mubr.bf16.mxu0 %v1259_v38  ;;  %v603_v6 = vmul.f32 %v2119_v43, %v583_v34  ;;  %v604_v9 = vmul.f32 %v2119_v43, %v584_v35  ;;  %v639_v13 = vunpack.c.l.bf16 %v1643_v37 }
  0x33   : > { %v659_v46 = vmul.f32 %v2122_v44, %v583_v34  ;;  %v505_v47 = vsel %vm482_vm1, %v503_v45, %v504_v42  ;;  %v507_v48 = vsel %vm482_vm1, %v504_v42, %v506_v3  ;;  %v660_v49 = vmul.f32 %v2122_v44, %v584_v35 }
  0x34   : > { %v779_v50 = vunpack.c.l.bf16 %v1651_v22  ;;  %v547_v52 = vadd.f32 %v505_v47, %v406_v30  ;;  %v548_v53 = vadd.f32 %v507_v48, %v407_v12  ;;  %v661_v54 = vmul.f32 %v2122_v44, %v639_v13  ;;  %v274_v12 = vld [vmem:[%s2065_s5 + $0x14] sm:$0x1] }
  0x35   : > { %v715_v55 = vrot.slane %v659_v46, 1  ;;  %v716_v56 = vrot.slane %v660_v49, 1  ;;  %v800_v58 = vmul.f32 %v2156_v17, %v584_v35  ;;  %v801_v59 = vmul.f32 %v2156_v17, %v639_v13 }
  0x36   : > { %v799_v57 = vmul.f32 %v2156_v17, %v779_v50  ;;  %v619_v60 = vadd.f32 %v603_v6, %v547_v52  ;;  %v620_v61 = vadd.f32 %v604_v9, %v548_v53  ;;  %v718_v62 = vrot.slane %v661_v54, 1  ;;  %v415_v53 = vld [vmem:[%s2065_s5 + $0xc] sm:$0xe] }
  0x37   : > { %v2239_v63 = vunpack.c.l.bf16 %v1829_v51  ;;  %v717_v1 = vsel %vm341_vm0, %v715_v55, %v716_v56  ;;  %v856_v7 = vrot.slane %v800_v58, 2  ;;  %v858_v8 = vrot.slane %v801_v59, 2 }
  0x38   : > { %v855_v2 = vrot.slane %v799_v57, 2  ;;  %v719_v10 = vsel %vm341_vm0, %v716_v56, %v718_v62  ;;  %v759_v11 = vadd.f32 %v717_v1, %v619_v60  ;;  %v2244_v14 = vunpack.c.h.bf16 %v1829_v51 }
  0x39   : > { %v955_v15 = vmul.f32 %v2239_v63, %v2176_v39  ;;  %v760_v18 = vadd.f32 %v719_v10, %v620_v61  ;;  %v859_v20 = vsel %vm482_vm1, %v856_v7, %v858_v8  ;;  %v991_v21 = vunpack.c.l.bf16 %v1677_v0 }
  0x3a   : > { %v857_v19 = vsel %vm482_vm1, %v855_v2, %v856_v7  ;;  %v956_v29 = vmul.f32 %v2244_v14, %v2176_v39  ;;  %v1011_v31 = vmul.f32 %v2239_v63, %v2179_v40  ;;  %v1012_v33 = vmul.f32 %v2244_v14, %v2179_v40 }
  0x3b   : > { %v899_v28 = vadd.f32 %v857_v19, %v759_v11  ;;  %v900_v34 = vadd.f32 %v859_v20, %v760_v18  ;;  %v1013_v35 = vmul.f32 %v2179_v40, %v991_v21  ;;  %v1131_v37 = vunpack.c.l.bf16 %v1685_v16 }
  0x3c   : > { %v1152_v38 = vmul.f32 %v2244_v14, %v2186_v27  ;;  %v1067_v42 = vrot.slane %v1011_v31, 1  ;;  %v1068_v22 = vrot.slane %v1012_v33, 1  ;;  %v1153_v30 = vmul.f32 %v2186_v27, %v991_v21  ;;  %v1648_v21 = vld [vmem:[%s2065_s5 + $0x18] sm:$0xe] }
  0x3d   : > { %v971_v23 = vadd.f32 %v955_v15, %v899_v28  ;;  %v972_v45 = vadd.f32 %v956_v29, %v900_v34  ;;  %v1070_v3 = vrot.slane %v1013_v35, 1  ;;  %v1151_v6 = vmul.f32 %v2186_v27, %v1131_v37  ;;  %v1640_v15 = vld [vmem:[%s2065_s5 + $0x20] sm:$0x1] }
  0x3e   : > { %v1208_v9 = vrot.slane %v1152_v38, 2  ;;  %v1069_v13 = vsel %vm341_vm0, %v1067_v42, %v1068_v22  ;;  %v1210_v46 = vrot.slane %v1153_v30, 2  ;;  %v223_v47 = vunpack.c.l.bf16 %v207_v41 }
  0x3f   : > { %v224_v48 = vunpack.c.h.bf16 %v207_v41  ;;  %v1071_v49 = vsel %vm341_vm0, %v1068_v22, %v1070_v3  ;;  %v1111_v50 = vadd.f32 %v1069_v13, %v971_v23  ;;  %v1207_v51 = vrot.slane %v1151_v6, 2  ;;  %v1659_v6 = vld [vmem:[%s2065_s5 + $0x24] sm:$0xff]  }
  0x40   : > { %v282_v52 = vunpack.c.l.bf16 %v274_v12  ;;  %v1112_v54 = vadd.f32 %v1071_v49, %v972_v45  ;;  %v1211_v55 = vsel %vm482_vm1, %v1208_v9, %v1210_v46  ;;  %v243_v56 = vmul.f32 %v2093_v24, %v223_v47 }
  0x41   : > { %v244_v57 = vmul.f32 %v2093_v24, %v224_v48  ;;  %v1209_v58 = vsel %vm482_vm1, %v1207_v51, %v1208_v9  ;;  %v296_v59 = vmul.f32 %v2096_v25, %v223_v47  ;;  %v297_v60 = vmul.f32 %v2096_v25, %v224_v48 }
  0x42   : > { %v298_v61 = vmul.f32 %v2096_v25, %v282_v52  ;;  %v1251_v62 = vadd.f32 %v1209_v58, %v1111_v50  ;;  %v1252_v0 = vadd.f32 %v1211_v55, %v1112_v54  ;;  %v423_v1 = vunpack.c.l.bf16 %v415_v53 }
  0x43   : > { %v438_v2 = vmul.f32 %v2099_v26, %v224_v48  ;;  %v347_v7 = vrot.slane %v296_v59, 1  ;;  %v348_v8 = vrot.slane %v297_v60, 1  ;;  %v439_v11 = vmul.f32 %v2099_v26, %v282_v52  ;;  %v1674_v48 = vld [vmem:[%s2065_s5 + $0x2c] sm:$0x1] }
  0x44   : > { %v350_v10 = vrot.slane %v298_v61, 1  ;;  %v1263_v16 = vpack.c.bf16 %v1252_v0, %v1251_v62  ;;  %v437_v18 = vmul.f32 %v2099_v26, %v423_v1  ;;  %v597_v20 = vmul.f32 %v2148_v4, %v2119_v43  ;;  %v1682_v61 = vld [vmem:[%s2065_s5 + $0x24] sm:$0xe] }
  0x45   : > { %v489_v19 = vrot.slane %v438_v2, 2  ;;  %v349_v28 = vsel %vm341_vm0, %v347_v7, %v348_v8  ;;  %v491_v31 = vrot.slane %v439_v11, 2  ;;  %v598_v33 = vmul.f32 %v2150_v5, %v2119_v43 }
  0x46   : > { %v351_v29 = vsel %vm341_vm0, %v348_v8, %v350_v10  ;;  %1878 = vmatprep.mubr.bf16.mxu1 %v1263_v16  ;;  %v400_v34 = vadd.f32 %v349_v28, %v243_v56  ;;  %v488_v37 = vrot.slane %v437_v18, 2  ;;  %v636_v38 = vunpack.c.l.bf16 %v1640_v15 }
  0x47   : > { %v401_v35 = vadd.f32 %v351_v29, %v244_v57  ;;  %v492_v41 = vsel %vm482_vm1, %v489_v19, %v491_v31  ;;  %v650_v23 = vmul.f32 %v2148_v4, %v2122_v44  ;;  %v651_v42 = vmul.f32 %v2150_v5, %v2122_v44 }
  0x48   : > { %v776_v22 = vunpack.c.l.bf16 %v1648_v21  ;;  %v490_v30 = vsel %vm482_vm1, %v488_v37, %v489_v19  ;;  %v652_v45 = vmul.f32 %v2122_v44, %v636_v38  ;;  %v791_v3 = vmul.f32 %v2150_v5, %v2156_v17 }
  0x49   : > { %v542_v12 = vadd.f32 %v492_v41, %v401_v35  ;;  %v541_v9 = vadd.f32 %v490_v30, %v400_v34  ;;  %v700_v13 = vrot.slane %v650_v23, 1  ;;  %v701_v46 = vrot.slane %v651_v42, 1 }
  0x4a   : > { %v790_v47 = vmul.f32 %v2156_v17, %v776_v22  ;;  %v703_v50 = vrot.slane %v652_v45, 1  ;;  %v792_v51 = vmul.f32 %v2156_v17, %v636_v38  ;;  %v841_v52 = vrot.slane %v791_v3, 2  ;;  %v278_v38 = vld [vmem:[%s2065_s5 + $0x44] sm:$0x1] }
  0x4b   : > { %v614_v49 = vadd.f32 %v598_v33, %v542_v12  ;;  %v613_v53 = vadd.f32 %v597_v20, %v541_v9  ;;  %v702_v54 = vsel %vm341_vm0, %v700_v13, %v701_v46  ;;  %v929_v56 = vunpack.c.l.bf16 %v1659_v6  ;;  %v215_v20 = vld [vmem:[%s2065_s5 + $0x3c] sm:$0xff]  }
  0x4c   : > { %v840_v55 = vrot.slane %v790_v47, 2  ;;  %v704_v57 = vsel %vm341_vm0, %v701_v46, %v703_v50  ;;  %v843_v58 = vrot.slane %v792_v51, 2  ;;  %v930_v59 = vunpack.c.h.bf16 %v1659_v6  ;;  %v419_v6 = vld [vmem:[%s2065_s5 + $0x3c] sm:$0xe] }
  0x4d   : > { %v988_v60 = vunpack.c.l.bf16 %v1674_v48  ;;  %v753_v62 = vadd.f32 %v702_v54, %v613_v53  ;;  %v754_v0 = vadd.f32 %v704_v57, %v614_v49  ;;  %v949_v2 = vmul.f32 %v2176_v39, %v929_v56 }
  0x4e   : > { %v842_v1 = vsel %vm482_vm1, %v840_v55, %v841_v52  ;;  %v844_v7 = vsel %vm482_vm1, %v841_v52, %v843_v58  ;;  %v950_v8 = vmul.f32 %v2176_v39, %v930_v59  ;;  %v1002_v10 = vmul.f32 %v2179_v40, %v929_v56 }
  0x4f   : > { %v1003_v11 = vmul.f32 %v2179_v40, %v930_v59  ;;  %v893_v15 = vadd.f32 %v842_v1, %v753_v62  ;;  %v894_v16 = vadd.f32 %v844_v7, %v754_v0  ;;  %v1004_v18 = vmul.f32 %v2179_v40, %v988_v60 }
  0x50   : > { %v1128_v19 = vunpack.c.l.bf16 %v1682_v61  ;;  %v1052_v21 = vrot.slane %v1002_v10, 1  ;;  %v1143_v29 = vmul.f32 %v2186_v27, %v930_v59  ;;  %v1144_v31 = vmul.f32 %v2186_v27, %v988_v60  ;;  %v1644_v60 = vld [vmem:[%s2065_s5 + $0x50] sm:$0x1] }
  0x51   : > { %v1053_v28 = vrot.slane %v1003_v11, 1  ;;  %v965_v33 = vadd.f32 %v949_v2, %v893_v15  ;;  %v966_v34 = vadd.f32 %v950_v8, %v894_v16  ;;  %v1055_v35 = vrot.slane %v1004_v18, 1  ;;  %v1652_v11 = vld [vmem:[%s2065_s5 + $0x48] sm:$0xe] }
  0x52   : > { %v1142_v37 = vmul.f32 %v2186_v27, %v1128_v19  ;;  %v1193_v23 = vrot.slane %v1143_v29, 2  ;;  %v1195_v42 = vrot.slane %v1144_v31, 2  ;;  %v231_v22 = vunpack.c.l.bf16 %v215_v20 }
  0x53   : > { %v1054_v41 = vsel %vm341_vm0, %v1052_v21, %v1053_v28  ;;  %v1056_v30 = vsel %vm341_vm0, %v1053_v28, %v1055_v35  ;;  %v232_v3 = vunpack.c.h.bf16 %v215_v20  ;;  %v286_v47 = vunpack.c.l.bf16 %v278_v38 }
  0x54   : > { %v1105_v12 = vadd.f32 %v1054_v41, %v965_v33  ;;  %v1192_v45 = vrot.slane %v1142_v37, 2  ;;  %v1106_v9 = vadd.f32 %v1056_v30, %v966_v34  ;;  %v1196_v13 = vsel %vm482_vm1, %v1193_v23, %v1195_v42  ;;  %v1667_v37 = vld [vmem:[%s2065_s5 + $0x54] sm:$0xff]  }
  0x55   : > { %v251_v46 = vmul.f32 %v2093_v24, %v231_v22  ;;  %v252_v49 = vmul.f32 %v2093_v24, %v232_v3  ;;  %v308_v50 = vmul.f32 %v2096_v25, %v231_v22  ;;  %v309_v51 = vmul.f32 %v2096_v25, %v232_v3 }
  0x56   : > { %v1194_v48 = vsel %vm482_vm1, %v1192_v45, %v1193_v23  ;;  %v1246_v53 = vadd.f32 %v1196_v13, %v1106_v9  ;;  %v310_v54 = vmul.f32 %v2096_v25, %v286_v47  ;;  %v427_v55 = vunpack.c.l.bf16 %v419_v6 }
  0x57   : > { %v1245_v52 = vadd.f32 %v1194_v48, %v1105_v12  ;;  %v367_v56 = vrot.slane %v308_v50, 1  ;;  %v368_v57 = vrot.slane %v309_v51, 1  ;;  %v450_v58 = vmul.f32 %v2099_v26, %v232_v3  ;;  %v1678_v3 = vld [vmem:[%s2065_s5 + $0x5c] sm:$0x1] }
  0x58   : > { %v451_v59 = vmul.f32 %v2099_v26, %v286_v47  ;;  %v370_v62 = vrot.slane %v310_v54, 1  ;;  %v449_v0 = vmul.f32 %v2099_v26, %v427_v55  ;;  %v605_v1 = vmul.f32 %v2239_v63, %v2119_v43  ;;  %v1686_v55 = vld [vmem:[%s2065_s5 + $0x54] sm:$0xe] }
  0x59   : > { %v1260_v61 = vpack.c.bf16 %v1246_v53, %v1245_v52  ;;  %v369_v2 = vsel %vm341_vm0, %v367_v56, %v368_v57  ;;  %v509_v7 = vrot.slane %v450_v58, 2  ;;  %v606_v10 = vmul.f32 %v2244_v14, %v2119_v43 }
  0x5a   : > { %v511_v8 = vrot.slane %v451_v59, 2  ;;  %v371_v15 = vsel %vm341_vm0, %v368_v57, %v370_v62  ;;  %v408_v16 = vadd.f32 %v369_v2, %v251_v46  ;;  %v508_v18 = vrot.slane %v449_v0, 2 }
  0x5b   : > { %1871 = vmatmul.mubr.bf16.vlgmr.msra.gmra.mrb[0].mxu0 %v1260_v61  ;;  %v640_v19 = vunpack.c.l.bf16 %v1644_v60  ;;  %v409_v20 = vadd.f32 %v371_v15, %v252_v49  ;;  %v662_v28 = vmul.f32 %v2239_v63, %v2122_v44  ;;  %v663_v29 = vmul.f32 %v2244_v14, %v2122_v44 }
  0x5c   : > { %v512_v21 = vsel %vm482_vm1, %v509_v7, %v511_v8  ;;  %v510_v31 = vsel %vm482_vm1, %v508_v18, %v509_v7  ;;  %v780_v34 = vunpack.c.l.bf16 %v1652_v11  ;;  %v803_v35 = vmul.f32 %v2244_v14, %v2156_v17 }
  0x5d   : > { %v664_v33 = vmul.f32 %v2122_v44, %v640_v19  ;;  %v549_v38 = vadd.f32 %v510_v31, %v408_v16  ;;  %v550_v41 = vadd.f32 %v512_v21, %v409_v20  ;;  %v720_v23 = vrot.slane %v662_v28, 1 }
  0x5e   : > { %v721_v42 = vrot.slane %v663_v29, 1  ;;  %v802_v30 = vmul.f32 %v2156_v17, %v780_v34  ;;  %v804_v12 = vmul.f32 %v2156_v17, %v640_v19  ;;  %v861_v45 = vrot.slane %v803_v35, 2  ;;  %v416_v29 = vld [vmem:[%s2065_s5 + $0x18] sm:$0xe] }
  0x5f   : > { %v723_v22 = vrot.slane %v664_v33, 1  ;;  %v621_v6 = vadd.f32 %v605_v1, %v549_v38  ;;  %v622_v9 = vadd.f32 %v606_v10, %v550_v41  ;;  %v937_v46 = vunpack.c.l.bf16 %v1667_v37  ;;  %v275_v10 = vld [vmem:[%s2065_s5 + $0x20] sm:$0x1] }
  0x60   : > { %v722_v13 = vsel %vm341_vm0, %v720_v23, %v721_v42  ;;  %v860_v48 = vrot.slane %v802_v30, 2  ;;  %v863_v49 = vrot.slane %v804_v12, 2  ;;  %v938_v50 = vunpack.c.h.bf16 %v1667_v37 }
  0x61   : > { %v724_v47 = vsel %vm341_vm0, %v721_v42, %v723_v22  ;;  %v761_v51 = vadd.f32 %v722_v13, %v621_v6  ;;  %v957_v53 = vmul.f32 %v2176_v39, %v937_v46  ;;  %v992_v54 = vunpack.c.l.bf16 %v1678_v3 }
  0x62   : > { %v762_v52 = vadd.f32 %v724_v47, %v622_v9  ;;  %v862_v56 = vsel %vm482_vm1, %v860_v48, %v861_v45  ;;  %v864_v57 = vsel %vm482_vm1, %v861_v45, %v863_v49  ;;  %v958_v58 = vmul.f32 %v2176_v39, %v938_v50  ;;  %v1627_v45 = vld [vmem:[%s2065_s5 + $0x24] sm:$0xff]  }
  0x63   : > { %v1014_v59 = vmul.f32 %v2179_v40, %v937_v46  ;;  %v901_v60 = vadd.f32 %v862_v56, %v761_v51  ;;  %v1015_v62 = vmul.f32 %v2179_v40, %v938_v50  ;;  %v1016_v0 = vmul.f32 %v2179_v40, %v992_v54 }
  0x64   : > { %v902_v61 = vadd.f32 %v864_v57, %v762_v52  ;;  %v1132_v2 = vunpack.c.l.bf16 %v1686_v55  ;;  %v1155_v7 = vmul.f32 %v2186_v27, %v938_v50  ;;  %v1156_v8 = vmul.f32 %v2186_v27, %v992_v54 }
  0x65   : > { %v1072_v1 = vrot.slane %v1014_v59, 1  ;;  %v973_v11 = vadd.f32 %v957_v53, %v901_v60  ;;  %v1073_v16 = vrot.slane %v1015_v62, 1  ;;  %v1075_v18 = vrot.slane %v1016_v0, 1  ;;  %v1641_v53 = vld [vmem:[%s2065_s5 + $0x2c] sm:$0x1] }
  0x66   : > { %v974_v15 = vadd.f32 %v958_v58, %v902_v61  ;;  %v1154_v19 = vmul.f32 %v2186_v27, %v1132_v2  ;;  %v1213_v20 = vrot.slane %v1155_v7, 2  ;;  %v1215_v21 = vrot.slane %v1156_v8, 2  ;;  %v1649_v58 = vld [vmem:[%s2065_s5 + $0x24] sm:$0xe] }
  0x67   : > { %v245_v28 = vmul.f32 %v2148_v4, %v2093_v24  ;;  %v1074_v31 = vsel %vm341_vm0, %v1072_v1, %v1073_v16  ;;  %v1076_v33 = vsel %vm341_vm0, %v1073_v16, %v1075_v18  ;;  %v246_v34 = vmul.f32 %v2150_v5, %v2093_v24 }
  0x68   : > { %v283_v35 = vunpack.c.l.bf16 %v275_v10  ;;  %v1113_v37 = vadd.f32 %v1074_v31, %v973_v11  ;;  %v1114_v38 = vadd.f32 %v1076_v33, %v974_v15  ;;  %v1212_v41 = vrot.slane %v1154_v19, 2  ;;  %v1675_v31 = vld [vmem:[%s2065_s5 + $0x38] sm:$0x1] }
  0x69   : > { %v1216_v23 = vsel %vm482_vm1, %v1213_v20, %v1215_v21  ;;  %v299_v42 = vmul.f32 %v2148_v4, %v2096_v25  ;;  %v300_v22 = vmul.f32 %v2150_v5, %v2096_v25  ;;  %v424_v12 = vunpack.c.l.bf16 %v416_v29 }
  0x6a   : > { %v301_v30 = vmul.f32 %v2096_v25, %v283_v35  ;;  %v1214_v3 = vsel %vm482_vm1, %v1212_v41, %v1213_v20  ;;  %v1254_v6 = vadd.f32 %v1216_v23, %v1114_v38  ;;  %v441_v9 = vmul.f32 %v2150_v5, %v2099_v26 }
  0x6b   : > { %v442_v13 = vmul.f32 %v2099_v26, %v283_v35  ;;  %v1253_v46 = vadd.f32 %v1214_v3, %v1113_v37  ;;  %v352_v47 = vrot.slane %v299_v42, 1  ;;  %v353_v4 = vrot.slane %v300_v22, 1  ;;  %v1683_v22 = vld [vmem:[%s2065_s5 + $0x30] sm:$0xe] }
  0x6c   : > { %v355_v48 = vrot.slane %v301_v30, 1  ;;  %v440_v49 = vmul.f32 %v2099_v26, %v424_v12  ;;  %v494_v50 = vrot.slane %v441_v9, 2  ;;  %v579_v52 = vunpack.c.l.bf16 %v1627_v45 }
  0x6d   : > { %v496_v51 = vrot.slane %v442_v13, 2  ;;  %v1264_v54 = vpack.c.bf16 %v1254_v6, %v1253_v46  ;;  %v354_v55 = vsel %vm341_vm0, %v352_v47, %v353_v4  ;;  %v580_v57 = vunpack.c.h.bf16 %v1627_v45 }
  0x6e   : > { %v356_v56 = vsel %vm341_vm0, %v353_v4, %v355_v48  ;;  %v402_v5 = vadd.f32 %v354_v55, %v245_v28  ;;  %v493_v60 = vrot.slane %v440_v49, 2  ;;  %v599_v62 = vmul.f32 %v2119_v43, %v579_v52 }
  0x6f   : > { %v403_v59 = vadd.f32 %v356_v56, %v246_v34  ;;  %v497_v61 = vsel %vm482_vm1, %v494_v50, %v496_v51  ;;  %1879 = vmatmul.mubr.bf16.vlgmr.msra.gmra.mrb[0].mxu1 %v1264_v54  ;;  %v600_v0 = vmul.f32 %v2119_v43, %v580_v57  ;;  %v637_v1 = vunpack.c.l.bf16 %v1641_v53 }
  0x70   : > { %v653_v2 = vmul.f32 %v2122_v44, %v579_v52  ;;  %v495_v7 = vsel %vm482_vm1, %v493_v60, %v494_v50  ;;  %v654_v10 = vmul.f32 %v2122_v44, %v580_v57  ;;  %v777_v11 = vunpack.c.l.bf16 %v1649_v58  ;;  %v279_v58 = vld [vmem:[%s2065_s5 + $0x50] sm:$0x1] }
  0x71   : > { %v544_v8 = vadd.f32 %v497_v61, %v403_v59  ;;  %v543_v15 = vadd.f32 %v495_v7, %v402_v5  ;;  %v655_v16 = vmul.f32 %v2122_v44, %v637_v1  ;;  %v794_v19 = vmul.f32 %v2156_v17, %v580_v57 }
  0x72   : > { %v705_v18 = vrot.slane %v653_v2, 1  ;;  %v706_v21 = vrot.slane %v654_v10, 1  ;;  %v793_v28 = vmul.f32 %v2156_v17, %v777_v11  ;;  %v795_v29 = vmul.f32 %v2156_v17, %v637_v1 }
  0x73   : > { %v616_v20 = vadd.f32 %v600_v0, %v544_v8  ;;  %v615_v33 = vadd.f32 %v599_v62, %v543_v15  ;;  %v708_v34 = vrot.slane %v655_v16, 1  ;;  %v846_v35 = vrot.slane %v794_v19, 2  ;;  %v420_v62 = vld [vmem:[%s2065_s5 + $0x48] sm:$0xe] }
  0x74   : > { %v951_v37 = vmul.f32 %v2170_v36, %v2176_v39  ;;  %v707_v38 = vsel %vm341_vm0, %v705_v18, %v706_v21  ;;  %v845_v41 = vrot.slane %v793_v28, 2  ;;  %v848_v23 = vrot.slane %v795_v29, 2 }
  0x75   : > { %v952_v42 = vmul.f32 %v2188_v32, %v2176_v39  ;;  %v709_v30 = vsel %vm341_vm0, %v706_v21, %v708_v34  ;;  %v755_v12 = vadd.f32 %v707_v38, %v615_v33  ;;  %v989_v45 = vunpack.c.l.bf16 %v1675_v31  ;;  %v1635_v21 = vld [vmem:[%s2065_s5 + $0x54] sm:$0xff]   ;;  %v1645_v34 = vld [vmem:[%s2065_s5 + $0x5c] sm:$0x1] }
  0x76   : > { %v1005_v3 = vmul.f32 %v2170_v36, %v2179_v40  ;;  %v756_v6 = vadd.f32 %v709_v30, %v616_v20  ;;  %v847_v9 = vsel %vm482_vm1, %v845_v41, %v846_v35  ;;  %v849_v13 = vsel %vm482_vm1, %v846_v35, %v848_v23 }
  0x77   : > { %v1006_v46 = vmul.f32 %v2188_v32, %v2179_v40  ;;  %v895_v47 = vadd.f32 %v847_v9, %v755_v12  ;;  %v1007_v4 = vmul.f32 %v2179_v40, %v989_v45  ;;  %v1129_v49 = vunpack.c.l.bf16 %v1683_v22 }
  0x78   : > { %v1057_v48 = vrot.slane %v1005_v3, 1  ;;  %v896_v50 = vadd.f32 %v849_v13, %v756_v6  ;;  %v1146_v52 = vmul.f32 %v2188_v32, %v2186_v27  ;;  %v1147_v53 = vmul.f32 %v2186_v27, %v989_v45  ;;  %v1653_v3 = vld [vmem:[%s2065_s5 + $0x54] sm:$0xe] }
  0x79   : > { %v1058_v51 = vrot.slane %v1006_v46, 1  ;;  %v967_v54 = vadd.f32 %v951_v37, %v895_v47  ;;  %v1060_v55 = vrot.slane %v1007_v4, 1  ;;  %v1145_v56 = vmul.f32 %v2186_v27, %v1129_v49 }
  0x7a   : > { %v253_v57 = vmul.f32 %v2239_v63, %v2093_v24  ;;  %v968_v5 = vadd.f32 %v952_v42, %v896_v50  ;;  %v1198_v60 = vrot.slane %v1146_v52, 2  ;;  %v1200_v61 = vrot.slane %v1147_v53, 2 }
  0x7b   : > { %v1059_v59 = vsel %vm341_vm0, %v1057_v48, %v1058_v51  ;;  %v1061_v0 = vsel %vm341_vm0, %v1058_v51, %v1060_v55  ;;  %v1197_v2 = vrot.slane %v1145_v56, 2  ;;  %v254_v7 = vmul.f32 %v2244_v14, %v2093_v24 }
  0x7c   : > { %v1107_v1 = vadd.f32 %v1059_v59, %v967_v54  ;;  %v1108_v8 = vadd.f32 %v1061_v0, %v968_v5  ;;  %v1201_v10 = vsel %vm482_vm1, %v1198_v60, %v1200_v61  ;;  %v287_v11 = vunpack.c.l.bf16 %v279_v58  ;;  %v1830_v54 = vld [vmem:[%s2065_s5 + $0x60] sm:$0xff]  }
  0x7d   : > { %v311_v15 = vmul.f32 %v2239_v63, %v2096_v25  ;;  %v1199_v16 = vsel %vm482_vm1, %v1197_v2, %v1198_v60  ;;  %v312_v18 = vmul.f32 %v2244_v14, %v2096_v25  ;;  %v428_v19 = vunpack.c.l.bf16 %v420_v62 }
  0x7e   : > { %v453_v20 = vmul.f32 %v2244_v14, %v2099_v26  ;;  %v1247_v28 = vadd.f32 %v1199_v16, %v1107_v1  ;;  %v1248_v29 = vadd.f32 %v1201_v10, %v1108_v8  ;;  %v313_v31 = vmul.f32 %v2096_v25, %v287_v11  ;;  %v1687_v16 = vld [vmem:[%s2065_s5 + $0x60] sm:$0xe] }
  0x7f   : > { %v372_v33 = vrot.slane %v311_v15, 1  ;;  %v373_v35 = vrot.slane %v312_v18, 1  ;;  %v452_v63 = vmul.f32 %v2099_v26, %v428_v19  ;;  %v454_v37 = vmul.f32 %v2099_v26, %v287_v11 }
  0x80   : > { %v514_v38 = vrot.slane %v453_v20, 2  ;;  %v1261_v41 = vpack.c.bf16 %v1248_v29, %v1247_v28  ;;  %v375_v23 = vrot.slane %v313_v31, 1  ;;  %v587_v42 = vunpack.c.l.bf16 %v1635_v21 }
  0x81   : > { %v588_v22 = vunpack.c.h.bf16 %v1635_v21  ;;  %v374_v14 = vsel %vm341_vm0, %v372_v33, %v373_v35  ;;  %v513_v30 = vrot.slane %v452_v63, 2  ;;  %v516_v12 = vrot.slane %v454_v37, 2 }
  0x82   : > { %v641_v45 = vunpack.c.l.bf16 %v1645_v34  ;;  %1874 = vmatprep.mubr.bf16.mxu0 %v1261_v41  ;;  %v376_v6 = vsel %vm341_vm0, %v373_v35, %v375_v23  ;;  %v410_v9 = vadd.f32 %v374_v14, %v253_v57  ;;  %v607_v13 = vmul.f32 %v2119_v43, %v587_v42  ;;  %v276_v14 = vld [vmem:[%s2065_s5 + $0x2c] sm:$0x1] }
  0x83   : > { %v608_v46 = vmul.f32 %v2119_v43, %v588_v22  ;;  %v411_v47 = vadd.f32 %v376_v6, %v254_v7  ;;  %v515_v4 = vsel %vm482_vm1, %v513_v30, %v514_v38  ;;  %v517_v48 = vsel %vm482_vm1, %v514_v38, %v516_v12  ;;  %v1679_v7 = vld [vmem:[%s2065_s5 + $0x68] sm:$0x1] }
  0x84   : > { %v665_v49 = vmul.f32 %v2122_v44, %v587_v42  ;;  %v551_v50 = vadd.f32 %v515_v4, %v410_v9  ;;  %v666_v51 = vmul.f32 %v2122_v44, %v588_v22  ;;  %v667_v52 = vmul.f32 %v2122_v44, %v641_v45  ;;  %v211_v38 = vld [vmem:[%s2065_s5 + $0x24] sm:$0xff]  }
  0x85   : > { %v781_v53 = vunpack.c.l.bf16 %v1653_v3  ;;  %v552_v55 = vadd.f32 %v517_v48, %v411_v47  ;;  %v806_v57 = vmul.f32 %v2156_v17, %v588_v22  ;;  %v807_v58 = vmul.f32 %v2156_v17, %v641_v45 }
  0x86   : > { %v725_v56 = vrot.slane %v665_v49, 1  ;;  %v623_v5 = vadd.f32 %v607_v13, %v551_v50  ;;  %v726_v59 = vrot.slane %v666_v51, 1  ;;  %v728_v60 = vrot.slane %v667_v52, 1  ;;  %v417_v50 = vld [vmem:[%s2065_s5 + $0x24] sm:$0xe] }
  0x87   : > { %v805_v61 = vmul.f32 %v2156_v17, %v781_v53  ;;  %v624_v62 = vadd.f32 %v608_v46, %v552_v55  ;;  %v866_v0 = vrot.slane %v806_v57, 2  ;;  %v868_v1 = vrot.slane %v807_v58, 2 }
  0x88   : > { %v2448_v2 = vunpack.c.l.bf16 %v1830_v54  ;;  %v727_v8 = vsel %vm341_vm0, %v725_v56, %v726_v59  ;;  %v729_v10 = vsel %vm341_vm0, %v726_v59, %v728_v60  ;;  %v2453_v15 = vunpack.c.h.bf16 %v1830_v54 }
  0x89   : > { %v865_v11 = vrot.slane %v805_v61, 2  ;;  %v763_v18 = vadd.f32 %v727_v8, %v623_v5  ;;  %v764_v19 = vadd.f32 %v729_v10, %v624_v62  ;;  %v869_v20 = vsel %vm482_vm1, %v866_v0, %v868_v1  ;;  %v1642_v8 = vld [vmem:[%s2065_s5 + $0x38] sm:$0x1] }
  0x8a   : > { %v959_v21 = vmul.f32 %v2448_v2, %v2176_v39  ;;  %v960_v29 = vmul.f32 %v2453_v15, %v2176_v39  ;;  %v993_v31 = vunpack.c.l.bf16 %v1679_v7  ;;  %v1017_v33 = vmul.f32 %v2448_v2, %v2179_v40 }
  0x8b   : > { %v867_v28 = vsel %vm482_vm1, %v865_v11, %v866_v0  ;;  %v904_v35 = vadd.f32 %v869_v20, %v764_v19  ;;  %v1018_v63 = vmul.f32 %v2453_v15, %v2179_v40  ;;  %v1133_v37 = vunpack.c.l.bf16 %v1687_v16 }
  0x8c   : > { %v903_v34 = vadd.f32 %v867_v28, %v763_v18  ;;  %v1019_v41 = vmul.f32 %v2179_v40, %v993_v31  ;;  %v1077_v23 = vrot.slane %v1017_v33, 1  ;;  %v1158_v42 = vmul.f32 %v2453_v15, %v2186_v27 }
  0x8d   : > { %v1159_v22 = vmul.f32 %v2186_v27, %v993_v31  ;;  %v976_v12 = vadd.f32 %v960_v29, %v904_v35  ;;  %v1078_v45 = vrot.slane %v1018_v63, 1  ;;  %v1157_v3 = vmul.f32 %v2186_v27, %v1133_v37  ;;  %v1650_v29 = vld [vmem:[%s2065_s5 + $0x30] sm:$0xe] }
  0x8e   : > { %v975_v30 = vadd.f32 %v959_v21, %v903_v34  ;;  %v1080_v6 = vrot.slane %v1019_v41, 1  ;;  %v1218_v9 = vrot.slane %v1158_v42, 2  ;;  %v227_v46 = vunpack.c.l.bf16 %v211_v38 }
  0x8f   : > { %v1220_v13 = vrot.slane %v1159_v22, 2  ;;  %v1079_v47 = vsel %vm341_vm0, %v1077_v23, %v1078_v45  ;;  %v1217_v4 = vrot.slane %v1157_v3, 2  ;;  %v228_v48 = vunpack.c.h.bf16 %v211_v38 }
  0x90   : > { %v284_v49 = vunpack.c.l.bf16 %v276_v14  ;;  %v1081_v51 = vsel %vm341_vm0, %v1078_v45, %v1080_v6  ;;  %v1115_v52 = vadd.f32 %v1079_v47, %v975_v30  ;;  %v247_v54 = vmul.f32 %v2093_v24, %v227_v46  ;;  %v1663_v30 = vld [vmem:[%s2065_s5 + $0x3c] sm:$0xff]  }
  0x91   : > { %v1221_v53 = vsel %vm482_vm1, %v1218_v9, %v1220_v13  ;;  %v1116_v55 = vadd.f32 %v1081_v51, %v976_v12  ;;  %v1219_v56 = vsel %vm482_vm1, %v1217_v4, %v1218_v9  ;;  %v248_v57 = vmul.f32 %v2093_v24, %v228_v48 }
  0x92   : > { %v302_v58 = vmul.f32 %v2096_v25, %v227_v46  ;;  %v1255_v5 = vadd.f32 %v1219_v56, %v1115_v52  ;;  %v303_v59 = vmul.f32 %v2096_v25, %v228_v48  ;;  %v304_v60 = vmul.f32 %v2096_v25, %v284_v49 }
  0x93   : > { %v425_v61 = vunpack.c.l.bf16 %v417_v50  ;;  %v1256_v62 = vadd.f32 %v1221_v53, %v1116_v55  ;;  %v444_v1 = vmul.f32 %v2099_v26, %v228_v48  ;;  %v445_v7 = vmul.f32 %v2099_v26, %v284_v49  ;;  %v1676_v50 = vld [vmem:[%s2065_s5 + $0x44] sm:$0x1] }
  0x94   : > { %v357_v0 = vrot.slane %v302_v58, 1  ;;  %v358_v10 = vrot.slane %v303_v59, 1  ;;  %v360_v11 = vrot.slane %v304_v60, 1  ;;  %v601_v18 = vmul.f32 %v2170_v36, %v2119_v43  ;;  %v1684_v58 = vld [vmem:[%s2065_s5 + $0x3c] sm:$0xe] }
  0x95   : > { %v443_v16 = vmul.f32 %v2099_v26, %v425_v61  ;;  %v1265_v19 = vpack.c.bf16 %v1256_v62, %v1255_v5  ;;  %v499_v20 = vrot.slane %v444_v1, 2  ;;  %v501_v21 = vrot.slane %v445_v7, 2 }
  0x96   : > { %v602_v28 = vmul.f32 %v2188_v32, %v2119_v43  ;;  %v359_v31 = vsel %vm341_vm0, %v357_v0, %v358_v10  ;;  %v361_v33 = vsel %vm341_vm0, %v358_v10, %v360_v11  ;;  %v638_v35 = vunpack.c.l.bf16 %v1642_v8  ;;  %v219_v8 = vld [vmem:[%s2065_s5 + $0x54] sm:$0xff]  }
  0x97   : > { %v498_v34 = vrot.slane %v443_v16, 2  ;;  %1882 = vmatprep.mubr.bf16.mxu1 %v1265_v19  ;;  %v404_v63 = vadd.f32 %v359_v31, %v247_v54  ;;  %v405_v37 = vadd.f32 %v361_v33, %v248_v57  ;;  %v502_v38 = vsel %vm482_vm1, %v499_v20, %v501_v21  ;;  %v280_v19 = vld [vmem:[%s2065_s5 + $0x5c] sm:$0x1] }
  0x98   : > { %v656_v41 = vmul.f32 %v2170_v36, %v2122_v44  ;;  %v657_v42 = vmul.f32 %v2188_v32, %v2122_v44  ;;  %v658_v22 = vmul.f32 %v2122_v44, %v638_v35  ;;  %v778_v14 = vunpack.c.l.bf16 %v1650_v29 }
  0x99   : > { %v500_v23 = vsel %vm482_vm1, %v498_v34, %v499_v20  ;;  %v546_v45 = vadd.f32 %v502_v38, %v405_v37  ;;  %v797_v6 = vmul.f32 %v2188_v32, %v2156_v17  ;;  %v798_v46 = vmul.f32 %v2156_v17, %v638_v35 }
  0x9a   : > { %v545_v12 = vadd.f32 %v500_v23, %v404_v63  ;;  %v710_v3 = vrot.slane %v656_v41, 1  ;;  %v711_v9 = vrot.slane %v657_v42, 1  ;;  %v713_v13 = vrot.slane %v658_v22, 1  ;;  %v421_v23 = vld [vmem:[%s2065_s5 + $0x54] sm:$0xe] }
  0x9b   : > { %v796_v36 = vmul.f32 %v2156_v17, %v778_v14  ;;  %v618_v4 = vadd.f32 %v602_v28, %v546_v45  ;;  %v851_v48 = vrot.slane %v797_v6, 2  ;;  %v933_v49 = vunpack.c.l.bf16 %v1663_v30 }
  0x9c   : > { %v617_v47 = vadd.f32 %v601_v18, %v545_v12  ;;  %v712_v51 = vsel %vm341_vm0, %v710_v3, %v711_v9  ;;  %v714_v52 = vsel %vm341_vm0, %v711_v9, %v713_v13  ;;  %v853_v54 = vrot.slane %v798_v46, 2 }
  0x9d   : > { %v850_v53 = vrot.slane %v796_v36, 2  ;;  %v758_v55 = vadd.f32 %v714_v52, %v618_v4  ;;  %v934_v56 = vunpack.c.h.bf16 %v1663_v30  ;;  %v953_v57 = vmul.f32 %v2176_v39, %v933_v49 }
  0x9e   : > { %v757_v32 = vadd.f32 %v712_v51, %v617_v47  ;;  %v854_v59 = vsel %vm482_vm1, %v851_v48, %v853_v54  ;;  %v990_v60 = vunpack.c.l.bf16 %v1676_v50  ;;  %v1008_v61 = vmul.f32 %v2179_v40, %v933_v49 }
  0x9f   : > { %v852_v5 = vsel %vm482_vm1, %v850_v53, %v851_v48  ;;  %v898_v0 = vadd.f32 %v854_v59, %v758_v55  ;;  %v954_v1 = vmul.f32 %v2176_v39, %v934_v56  ;;  %v1009_v7 = vmul.f32 %v2179_v40, %v934_v56  ;;  %v1646_v53 = vld [vmem:[%s2065_s5 + $0x68] sm:$0x1] }
  0xa0   : > { %v897_v62 = vadd.f32 %v852_v5, %v757_v32  ;;  %v1010_v10 = vmul.f32 %v2179_v40, %v990_v60  ;;  %v1062_v11 = vrot.slane %v1008_v61, 1  ;;  %v1130_v16 = vunpack.c.l.bf16 %v1684_v58 }
  0xa1   : > { %v1149_v18 = vmul.f32 %v2186_v27, %v934_v56  ;;  %v970_v21 = vadd.f32 %v954_v1, %v898_v0  ;;  %v1063_v28 = vrot.slane %v1009_v7, 1  ;;  %v1150_v29 = vmul.f32 %v2186_v27, %v990_v60  ;;  %v1654_v56 = vld [vmem:[%s2065_s5 + $0x60] sm:$0xe] }
  0xa2   : > { %v969_v20 = vadd.f32 %v953_v57, %v897_v62  ;;  %v1065_v31 = vrot.slane %v1010_v10, 1  ;;  %v1148_v33 = vmul.f32 %v2186_v27, %v1130_v16  ;;  %v235_v35 = vunpack.c.l.bf16 %v219_v8 }
  0xa3   : > { %v1203_v34 = vrot.slane %v1149_v18, 2  ;;  %v1064_v63 = vsel %vm341_vm0, %v1062_v11, %v1063_v28  ;;  %v1205_v37 = vrot.slane %v1150_v29, 2  ;;  %v236_v38 = vunpack.c.h.bf16 %v219_v8  ;;  %v1671_v8 = vld [vmem:[%s2065_s5 + $0x6c] sm:$0xff]  }
  0xa4   : > { %v288_v41 = vunpack.c.l.bf16 %v280_v19  ;;  %v1066_v42 = vsel %vm341_vm0, %v1063_v28, %v1065_v31  ;;  %v1109_v22 = vadd.f32 %v1064_v63, %v969_v20  ;;  %v1202_v14 = vrot.slane %v1148_v33, 2 }
  0xa5   : > { %v255_v30 = vmul.f32 %v2093_v24, %v235_v35  ;;  %v1110_v12 = vadd.f32 %v1066_v42, %v970_v21  ;;  %v1206_v45 = vsel %vm482_vm1, %v1203_v34, %v1205_v37  ;;  %v256_v3 = vmul.f32 %v2093_v24, %v236_v38 }
  0xa6   : > { %v314_v6 = vmul.f32 %v2096_v25, %v235_v35  ;;  %v1204_v9 = vsel %vm482_vm1, %v1202_v14, %v1203_v34  ;;  %v315_v13 = vmul.f32 %v2096_v25, %v236_v38  ;;  %v316_v36 = vmul.f32 %v2096_v25, %v288_v41  ;;  %v1680_v34 = vld [vmem:[%s2065_s5 + $0x74] sm:$0x1] }
  0xa7   : > { %v429_v46 = vunpack.c.l.bf16 %v421_v23  ;;  %v1249_v47 = vadd.f32 %v1204_v9, %v1109_v22  ;;  %v1250_v4 = vadd.f32 %v1206_v45, %v1110_v12  ;;  %v456_v49 = vmul.f32 %v2099_v26, %v236_v38  ;;  %v1688_v22 = vld [vmem:[%s2065_s5 + $0x6c] sm:$0xe]  ;;  %s194_s5 = scalar_lea.vmem %s2596_s3, %s1617_s29 }
  0xa8   : > { %v377_v48 = vrot.slane %v314_v6, 1  ;;  %v378_v50 = vrot.slane %v315_v13, 1  ;;  %v380_v51 = vrot.slane %v316_v36, 1  ;;  %v457_v24 = vmul.f32 %v2099_v26, %v288_v41 }
  0xa9   : > { %v455_v52 = vmul.f32 %v2099_v26, %v429_v46  ;;  %v1262_v54 = vpack.c.bf16 %v1250_v4, %v1249_v47  ;;  %v519_v32 = vrot.slane %v456_v49, 2  ;;  %v609_v55 = vmul.f32 %v2448_v2, %v2119_v43 }
  0xaa   : > { %v610_v25 = vmul.f32 %v2453_v15, %v2119_v43  ;;  %v379_v57 = vsel %vm341_vm0, %v377_v48, %v378_v50  ;;  %v381_v58 = vsel %vm341_vm0, %v378_v50, %v380_v51  ;;  %v521_v59 = vrot.slane %v457_v24, 2 }
  0xab   : > { %v518_v5 = vrot.slane %v455_v52, 2  ;;  %1875 = vmatmul.mubr.bf16.gmra.mrb[4].mxu0 %v1262_v54  ;;  %v412_v60 = vadd.f32 %v379_v57, %v255_v30  ;;  %v413_v26 = vadd.f32 %v381_v58, %v256_v3  ;;  %v642_v61 = vunpack.c.l.bf16 %v1646_v53 }
  0xac   : > { %v668_v62 = vmul.f32 %v2448_v2, %v2122_v44  ;;  %v522_v1 = vsel %vm482_vm1, %v519_v32, %v521_v59  ;;  %v669_v43 = vmul.f32 %v2453_v15, %v2122_v44  ;;  %v782_v7 = vunpack.c.l.bf16 %v1654_v56 }
  0xad   : > { %v520_v0 = vsel %vm482_vm1, %v518_v5, %v519_v32  ;;  %v554_v11 = vadd.f32 %v522_v1, %v413_v26  ;;  %v670_v16 = vmul.f32 %v2122_v44, %v642_v61  ;;  %v809_v2 = vmul.f32 %v2453_v15, %v2156_v17 }
  0xae   : > { %v553_v10 = vadd.f32 %v520_v0, %v412_v60  ;;  %v730_v18 = vrot.slane %v668_v62, 1  ;;  %v731_v19 = vrot.slane %v669_v43, 1  ;;  %v808_v20 = vmul.f32 %v2156_v17, %v782_v7 }
  0xaf   : > { %v810_v21 = vmul.f32 %v2156_v17, %v642_v61  ;;  %v626_v29 = vadd.f32 %v610_v25, %v554_v11  ;;  %v733_v31 = vrot.slane %v670_v16, 1  ;;  %v941_v33 = vunpack.c.l.bf16 %v1671_v8 }
  0xb0   : > { %v625_v28 = vadd.f32 %v609_v55, %v553_v10  ;;  %v732_v35 = vsel %vm341_vm0, %v730_v18, %v731_v19  ;;  %v870_v63 = vrot.slane %v808_v20, 2  ;;  %v871_v37 = vrot.slane %v809_v2, 2 }
  0xb1   : > { %v873_v44 = vrot.slane %v810_v21, 2  ;;  %v734_v38 = vsel %vm341_vm0, %v731_v19, %v733_v31  ;;  %v942_v23 = vunpack.c.h.bf16 %v1671_v8  ;;  %v961_v42 = vmul.f32 %v2176_v39, %v941_v33 }
  0xb2   : > { %v765_v41 = vadd.f32 %v732_v35, %v625_v28  ;;  %v766_v15 = vadd.f32 %v734_v38, %v626_v29  ;;  %v872_v17 = vsel %vm482_vm1, %v870_v63, %v871_v37  ;;  %v994_v30 = vunpack.c.l.bf16 %v1680_v34 }
  0xb3   : > { %v874_v14 = vsel %vm482_vm1, %v871_v37, %v873_v44  ;;  %v962_v45 = vmul.f32 %v2176_v39, %v942_v23  ;;  %v1020_v3 = vmul.f32 %v2179_v40, %v941_v33  ;;  %v1021_v6 = vmul.f32 %v2179_v40, %v942_v23 }
  0xb4   : > { %v905_v12 = vadd.f32 %v872_v17, %v765_v41  ;;  %v906_v9 = vadd.f32 %v874_v14, %v766_v15  ;;  %v1022_v13 = vmul.f32 %v2179_v40, %v994_v30  ;;  %v1134_v36 = vunpack.c.l.bf16 %v1688_v22 }
  0xb5   : > { %v1161_v46 = vmul.f32 %v2186_v27, %v942_v23  ;;  %v1082_v4 = vrot.slane %v1020_v3, 1  ;;  %v1083_v48 = vrot.slane %v1021_v6, 1  ;;  %v1162_v49 = vmul.f32 %v2186_v27, %v994_v30 }
  0xb6   : > { %v977_v47 = vadd.f32 %v961_v42, %v905_v12  ;;  %v978_v50 = vadd.f32 %v962_v45, %v906_v9  ;;  %v1085_v51 = vrot.slane %v1022_v13, 1  ;;  %v1160_v39 = vmul.f32 %v2186_v27, %v1134_v36 }
  0xb7   : > { %v1223_v52 = vrot.slane %v1161_v46, 2  ;;  %v1084_v24 = vsel %vm341_vm0, %v1082_v4, %v1083_v48  ;;  %v1225_v53 = vrot.slane %v1162_v49, 2 }
  0xb8   : > { %v1086_v40 = vsel %vm341_vm0, %v1083_v48, %v1085_v51  ;;  %v1117_v54 = vadd.f32 %v1084_v24, %v977_v47  ;;  %v1222_v32 = vrot.slane %v1160_v39, 2 }
  0xb9   : > { %v1118_v55 = vadd.f32 %v1086_v40, %v978_v50  ;;  %v1226_v25 = vsel %vm482_vm1, %v1223_v52, %v1225_v53 }
  0xba   : > { %v1224_v56 = vsel %vm482_vm1, %v1222_v32, %v1223_v52 }
  0xbb   : > { %v1257_v57 = vadd.f32 %v1224_v56, %v1117_v54  ;;  %v1258_v58 = vadd.f32 %v1226_v25, %v1118_v55 }
  0xbd   : > { %v1266_v5 = vpack.c.bf16 %v1258_v58, %v1257_v57 }
  0xbf   : > { %1883 = vmatmul.mubr.bf16.gmra.mrb[4].mxu1 %v1266_v5 }
 0x12e   : > { %v1872_v27 = vpop.f32.mrb[0].mxu0 }
 0x12f   : > { %v1365_v59 = vpop.f32.mrb[1].mxu0 }
 0x130   : > { %v1873_v60 = vpop.f32.mrb[2].mxu0 }
 0x131   : > { %v1788_v26 = vpack.c.bf16 %v1873_v60, %v1872_v27  ;;  %v1368_v61 = vpop.f32.mrb[3].mxu0 }
 0x132   : > { %v1783_v62 = vpack.c.bf16 %v1368_v61, %v1365_v59 }
 0x133   : > { %1831 = vst [vmem:[%s194_s5 + $0x8] sm:$0xff] %v1788_v26  }
 0x134   : > { %1784 = vst [vmem:[%s194_s5] sm:$0xff] %v1783_v62  }
 0x142   : > { %v1880_v0 = vpop.f32.mrb[0].mxu1 }
 0x143   : > { %v1397_v1 = vpop.f32.mrb[1].mxu1 }
 0x144   : > { %v1881_v43 = vpop.f32.mrb[2].mxu1 }
 0x145   : > { %v1808_v7 = vpack.c.bf16 %v1881_v43, %v1880_v0  ;;  %v1400_v8 = vpop.f32.mrb[3].mxu1 }
 0x146   : > { %v1803_v10 = vpack.c.bf16 %v1400_v8, %v1397_v1 }
 0x147   : > { %1835 = vst [vmem:[%s194_s5 + $0x28] sm:$0xff] %v1808_v7  }
 0x148   : > { %1834 = vst [vmem:[%s194_s5 + $0x20] sm:$0xff] %v1803_v10  }
 0x17e   : > { %v1876_v11 = vpop.f32.mrb[4].mxu0 }
 0x17f   : > { %v1381_v16 = vpop.f32.mrb[5].mxu0 }
 0x180   : > { %v1877_v18 = vpop.f32.mrb[6].mxu0 }
 0x181   : > { %v1798_v19 = vpack.c.bf16 %v1877_v18, %v1876_v11  ;;  %v1384_v20 = vpop.f32.mrb[7].mxu0 }
 0x182   : > { %v1793_v2 = vpack.c.bf16 %v1384_v20, %v1381_v16 }
 0x183   : > { %1833 = vst [vmem:[%s194_s5 + $0x18] sm:$0xff] %v1798_v19  }
 0x184   : > { %1832 = vst [vmem:[%s194_s5 + $0x10] sm:$0xff] %v1793_v2  }
 0x192   : > { %v1884_v21 = vpop.f32.mrb[4].mxu1 }
 0x193   : > { %v1413_v28 = vpop.f32.mrb[5].mxu1 }
 0x194   : > { %v1885_v29 = vpop.f32.mrb[6].mxu1 }
 0x195   : > { %v1818_v31 = vpack.c.bf16 %v1885_v29, %v1884_v21  ;;  %v1416_v33 = vpop.f32.mrb[7].mxu1 }
 0x196   : > { %v1813_v34 = vpack.c.bf16 %v1416_v33, %v1413_v28 }
 0x197   : > { %1837 = vst [vmem:[%s194_s5 + $0x38] sm:$0xff] %v1818_v31  }
 0x198   : > { %1836 = vst [vmem:[%s194_s5 + $0x30] sm:$0xff] %v1813_v34  }
 0x199 PF: > { %s13_s16 = sadd.s32 1, %s1989_s16   ;;  %s2597_s12 = smov %s1981_s14 }
 0x19a   : > { %p10_p7 = scmp.ge.s32.totalorder %s13_s16, 6   ;;  %s2598_s13 = smov %s1985_s15 }
 0x19b   : > { %s2599_s14 = smov %s2602_s17  ;;  %s2600_s15 = smov %s2606_s18 }
 0x19c   :  { %12 = sbr.rel (!%p10_p7) target bundleno = 3 (0x3), region = 65 }

</bundles_post_ra>
